<compile_context>
chip_gen: v6e
topology: v6e:2x2x1
jax: 0.10.0
libtpu: 0.0.40
codegen_flags: <defaults>
</compile_context>

<pallas_src>
import functools
from collections import namedtuple

import jax
import jax.numpy as jnp
from jax.experimental import pallas as pl
from jax.experimental.pallas import tpu as pltpu


def _vmem_limit_bytes():
    # ~75% of physical VMEM, capped at 96 MiB:
    #   v5e/v6e (128 MiB physical) -> 96 MiB, v7x (64 MiB physical) -> 48 MiB.
    try:
        cap = pltpu.get_tpu_info().vmem_capacity_bytes
        return int(min(cap * 3 // 4, 96 * 1024 * 1024))
    except Exception:
        return 48 * 1024 * 1024


_VMEM_LIMIT_BYTES = _vmem_limit_bytes()


def _compiler_params(dimension_semantics):
    return pltpu.CompilerParams(
        dimension_semantics=dimension_semantics,
        vmem_limit_bytes=_VMEM_LIMIT_BYTES,
    )


def _row_tile(n, max_tile=512):
    # Token-dimension tile.  Prefer >= 2 balanced, 8-row-aligned tiles so the
    # "parallel" token axis shards across both v7x TensorCores; cap at 512
    # rows (measured ~85% of HBM roofline on v6e at 512-row tiles).
    if n <= 8:
        return n
    half = -(-n // 2)            # ceil(n / 2)
    half = -(-half // 8) * 8     # round up to a sublane multiple
    return min(half, max_tile, n)


# ----------------------------------------------------------------------------
# Pallas kernels
# ----------------------------------------------------------------------------

def _layernorm_f32(x, g, b, eps):
    mu = jnp.mean(x, axis=-1, keepdims=True)
    var = jnp.mean(jnp.square(x - mu), axis=-1, keepdims=True)
    return (x - mu) * jax.lax.rsqrt(var + eps) * g + b


def _patch_embed_kernel(p_ref, w_ref, b_ref, pos_ref, o_ref):
    # p_ref: (TF, NP, CPPp) bf16, w_ref: (CPPp, D) bf16, b_ref: (1, D) f32,
    # pos_ref: (NP, D) f32, o_ref: (TF, NP, D) f32
    tf, np_, cpp = p_ref.shape
    d = w_ref.shape[1]
    x = p_ref[...].reshape(tf * np_, cpp)
    y = jnp.dot(x, w_ref[...], preferred_element_type=jnp.float32)
    o_ref[...] = y.reshape(tf, np_, d) + b_ref[...] + pos_ref[...]


def _ln1_attn_block_kernel(x_ref, g_ref, be_ref, wqkv_ref, bqkv_ref,
                           wo_ref, bo_ref, o_ref,
                           q_sc, k_sc, v_sc, ctx_sc, *, num_heads, eps):
    # One frame per grid step: out = x + proj(attn(LN1(x))).
    # q/k/v and the attention context never leave VMEM.
    # TODO(synk): for long sequences (S >= 512), switch to a KV-blocked
    # online-softmax (flash-style) accumulator instead of the full (H, S, S)
    # score tile, with an 'arbitrary' grid axis over KV.
    s, d = x_ref.shape[1], x_ref.shape[2]
    dh = d // num_heads
    x = x_ref[0]
    xn = _layernorm_f32(x, g_ref[...], be_ref[...], eps).astype(jnp.bfloat16)

    # Single fused QKV matmul; 1/sqrt(Dh) is already folded into the Q
    # columns (and bias) of wqkv/bqkv at prep time.
    qkv = jnp.dot(xn, wqkv_ref[...],
                  preferred_element_type=jnp.float32) + bqkv_ref[...]

    # Re-layout (S, 3D) -> three (H, S, Dh) bf16 VMEM scratches so the score
    # and PV matmuls run head-batched on the MXU (no per-head K=Dh matmuls,
    # single softmax over all heads, bounded live ranges).
    for h in range(num_heads):
        q_sc[h] = qkv[:, h * dh:(h + 1) * dh].astype(jnp.bfloat16)
        k_sc[h] = qkv[:, d + h * dh:d + (h + 1) * dh].astype(jnp.bfloat16)
        v_sc[h] = qkv[:, 2 * d + h * dh:2 * d + (h + 1) * dh].astype(jnp.bfloat16)

    scores = jnp.einsum('hqd,hkd->hqk', q_sc[...], k_sc[...],
                        preferred_element_type=jnp.float32)
    scores = scores - jnp.max(scores, axis=-1, keepdims=True)
    p = jnp.exp(scores)
    p = p * pl.reciprocal(jnp.sum(p, axis=-1, keepdims=True), approx=True)

    ctx = jnp.einsum('hqk,hkd->hqd', p.astype(jnp.bfloat16), v_sc[...],
                     preferred_element_type=jnp.float32)

    # Stream per-head context into an (S, D) bf16 scratch (no concatenate),
    # then one K=D projection matmul fused with the residual add.
    for h in range(num_heads):
        ctx_sc[:, h * dh:(h + 1) * dh] = ctx[h].astype(jnp.bfloat16)

    o_ref[0] = x + jnp.dot(ctx_sc[...], wo_ref[...],
                           preferred_element_type=jnp.float32) + bo_ref[...]


def _ln_mlp_residual_kernel(x_ref, g_ref, be_ref, w1_ref, b1_ref, w2_ref,
                            b2_ref, o_ref, *, eps):
    # out = x + fc2(GELU(fc1(LN(x))))  -- MLP intermediate stays in VMEM.
    x = x_ref[...]
    xn = _layernorm_f32(x, g_ref[...], be_ref[...], eps).astype(jnp.bfloat16)
    h = jnp.dot(xn, w1_ref[...], preferred_element_type=jnp.float32) + b1_ref[...]
    # TODO(synk): HF ViT uses exact (erf) GELU; tanh approximation used here.
    h = jax.nn.gelu(h, approximate=True)
    y = jnp.dot(h.astype(jnp.bfloat16), w2_ref[...],
                preferred_element_type=jnp.float32)
    o_ref[...] = x + y + b2_ref[...]


# ----------------------------------------------------------------------------
# Pallas wrappers
# ----------------------------------------------------------------------------

def patch_embed(patches, wp, bp, pos, *, frames_per_step=8):
    BT, NP, CPP = patches.shape
    D = wp.shape[1]
    # Keep the frame grid >= 2 when possible (v7x has 2 TensorCores).
    TF = min(frames_per_step, max(1, -(-BT // 2)))
    return pl.pallas_call(
        _patch_embed_kernel,
        grid=(pl.cdiv(BT, TF),),
        out_shape=jax.ShapeDtypeStruct((BT, NP, D), jnp.float32),
        in_specs=[
            pl.BlockSpec((TF, NP, CPP), lambda i: (i, 0, 0)),
            pl.BlockSpec((CPP, D), lambda i: (0, 0)),
            pl.BlockSpec((1, D), lambda i: (0, 0)),
            pl.BlockSpec((NP, D), lambda i: (0, 0)),
        ],
        out_specs=pl.BlockSpec((TF, NP, D), lambda i: (i, 0, 0)),
        compiler_params=_compiler_params(("parallel",)),
    )(patches, wp, bp, pos)


def ln1_attn_block(x, g, b, wqkv, bqkv, wo, bo, *, num_heads, eps):
    BT, S, D = x.shape
    Dh = D // num_heads
    frame_spec = pl.BlockSpec((1, S, D), lambda i: (i, 0, 0))

    def resident(shape):
        # TODO(synk): pipeline_mode=pl.Buffered(1) would single-buffer these
        # never-changing weights (worth ~half their VMEM footprint on v7x).
        return pl.BlockSpec(shape, lambda i: (0, 0))

    return pl.pallas_call(
        functools.partial(_ln1_attn_block_kernel, num_heads=num_heads, eps=eps),
        grid=(BT,),
        out_shape=jax.ShapeDtypeStruct((BT, S, D), jnp.float32),
        in_specs=[
            frame_spec,
            resident((1, D)), resident((1, D)),
            resident((D, 3 * D)), resident((1, 3 * D)),
            resident((D, D)), resident((1, D)),
        ],
        out_specs=frame_spec,
        scratch_shapes=[pltpu.VMEM((num_heads, S, Dh), jnp.bfloat16)] * 3
                       + [pltpu.VMEM((S, D), jnp.bfloat16)],
        compiler_params=_compiler_params(("parallel",)),
    )(x, g, b, wqkv, bqkv, wo, bo)


def ln_mlp_residual(x, g, b, w1, b1, w2, b2, *, eps):
    N, D = x.shape
    M = w1.shape[1]
    TM = _row_tile(N)
    row_spec = pl.BlockSpec((TM, D), lambda i: (i, 0))
    # TODO(synk): on v7x at real sizes, add an 'arbitrary' grid axis over the
    # MLP intermediate M with an f32 VMEM accumulator for fc2 partial sums.
    return pl.pallas_call(
        functools.partial(_ln_mlp_residual_kernel, eps=eps),
        grid=(pl.cdiv(N, TM),),
        out_shape=jax.ShapeDtypeStruct((N, D), jnp.float32),
        in_specs=[
            row_spec,
            pl.BlockSpec((1, D), lambda i: (0, 0)),
            pl.BlockSpec((1, D), lambda i: (0, 0)),
            pl.BlockSpec((D, M), lambda i: (0, 0)),
            pl.BlockSpec((1, M), lambda i: (0, 0)),
            pl.BlockSpec((M, D), lambda i: (0, 0)),
            pl.BlockSpec((1, D), lambda i: (0, 0)),
        ],
        out_specs=row_spec,
        compiler_params=_compiler_params(("parallel",)),
    )(x, g, b, w1, b1, w2, b2)


# ----------------------------------------------------------------------------
# Model glue (plain JAX)
# ----------------------------------------------------------------------------

ViTPoseVisualEncoderOutput = namedtuple(
    "ViTPoseVisualEncoderOutput", ["hidden_state", "video_length", "heatmaps"]
)


def _extract_patches(x_nchw, patch, cpp_padded):
    # (BT, C, H, W) NCHW -> (BT, num_patches, C*P*P) with the K axis zero
    # padded to a lane-aligned width; flattening order (C, Ph, Pw) matches
    # PyTorch Conv2d weight (D, C, P, P) flattened to (D, C*P*P).
    BT, C, H, W = x_nchw.shape
    P = patch
    x = x_nchw.reshape(BT, C, H // P, P, W // P, P)
    x = x.transpose(0, 2, 4, 1, 3, 5)            # (BT, H/P, W/P, C, P, P)
    x = x.reshape(BT, (H // P) * (W // P), C * P * P)
    pad = cpp_padded - C * P * P
    if pad:
        x = jnp.pad(x, ((0, 0), (0, 0), (0, pad)))
    return x.astype(jnp.bfloat16)                # halve the patch DMA


def _encoder_layer(hidden, p, *, num_heads, eps):
    BT, S, D = hidden.shape
    # Fused LN1 + QKV + attention + output projection + residual (per frame).
    hidden = ln1_attn_block(hidden, p["ln1_g"], p["ln1_b"],
                            p["wqkv"], p["bqkv"], p["wo"], p["bo"],
                            num_heads=num_heads, eps=eps)
    # Fused LN2 + fc1 + GELU + fc2 + residual (token-tiled).
    xf = ln_mlp_residual(hidden.reshape(BT * S, D), p["ln2_g"], p["ln2_b"],
                         p["w1"], p["b1"], p["w2"], p["b2"], eps=eps)
    return xf.reshape(BT, S, D)


def vitpose_lora_forward(video, video_length, prep, cfg):
    B, T, C, H, W = video.shape
    assert (H, W) == tuple(cfg["image_size"]), "Input video size mismatch"
    BT = B * T
    x = video.reshape(BT, C, H, W)  # 'b t c h w -> (b t) c h w'

    cpp_padded = prep["patch_w"].shape[0]
    patches = _extract_patches(x, cfg["patch"], cpp_padded)
    hidden = patch_embed(patches, prep["patch_w"], prep["patch_b"], prep["pos"])

    hidden_states = [hidden]
    for p in prep["layers"]:
        hidden = _encoder_layer(hidden, p, num_heads=cfg["num_heads"],
                                eps=cfg["layer_norm_eps"])
        hidden_states.append(hidden)

    hs = hidden_states[cfg["hidden_states_layer"]]
    NP, D = hs.shape[1], hs.shape[2]
    hidden_state = hs.reshape(B, T, NP, D)  # '(b t) hw d -> b t hw d'
    return ViTPoseVisualEncoderOutput(
        hidden_state=hidden_state, video_length=video_length, heatmaps=None
    )


# ----------------------------------------------------------------------------
# Deterministic synthetic parameter init + inference-time preparation
# ----------------------------------------------------------------------------

def _init_lora_dense(key, din, dout, rank):
    k1, k2, k3, k4 = jax.random.split(key, 4)
    w = jax.random.normal(k1, (din, dout), jnp.float32) * 0.02
    b = jax.random.normal(k2, (1, dout), jnp.float32) * 0.02
    a = jax.random.normal(k3, (din, rank), jnp.float32) * 0.02
    # peft inits LoRA "B" to zero; non-zero here so the folded LoRA path
    # contributes real signal in this synthetic setup.
    bm = jax.random.normal(k4, (rank, dout), jnp.float32) * 0.02
    return (w, b, a, bm)


def init_params(key, cfg):
    C, P, D, M, r = (cfg["channels"], cfg["patch"], cfg["hidden"],
                     cfg["mlp"], cfg["lora_rank"])
    NP = (cfg["image_size"][0] // P) * (cfg["image_size"][1] // P)

    keys = jax.random.split(key, 3 + cfg["num_layers"])
    params = {
        "patch_w": jax.random.normal(keys[0], (C * P * P, D), jnp.float32) * 0.02,
        "patch_b": jax.random.normal(keys[1], (1, D), jnp.float32) * 0.02,
        "pos": jax.random.normal(keys[2], (NP, D), jnp.float32) * 0.02,
        "layers": [],
    }
    for li in range(cfg["num_layers"]):
        lk = jax.random.split(keys[3 + li], 6)
        params["layers"].append(
            {
                "ln1_g": jnp.ones((1, D), jnp.float32),
                "ln1_b": jnp.zeros((1, D), jnp.float32),
                "ln2_g": jnp.ones((1, D), jnp.float32),
                "ln2_b": jnp.zeros((1, D), jnp.float32),
                "q": _init_lora_dense(lk[0], D, D, r),
                "k": _init_lora_dense(lk[1], D, D, r),
                "v": _init_lora_dense(lk[2], D, D, r),
                "attn_out": _init_lora_dense(lk[3], D, D, r),
                "fc1": _init_lora_dense(lk[4], D, M, r),
                "fc2": _init_lora_dense(lk[5], M, D, r),
            }
        )
    return params


def _fold_lora(w, b, a, bm, scale):
    # Inference fold: y = x@W + b + scale*(x@A)@B  ==  x@(W + scale*A@B) + b
    # (LoRA dropout is identity at inference).  Fold kept in f32.
    w = w.astype(jnp.float32)
    if scale != 0.0:
        w = w + scale * (a.astype(jnp.float32) @ bm.astype(jnp.float32))
    return w, b.astype(jnp.float32)


def prepare_inference_params(params, cfg):
    C, P, D = cfg["channels"], cfg["patch"], cfg["hidden"]
    H = cfg["num_heads"]
    Dh = D // H
    CPP = C * P * P
    CPPp = ((CPP + 127) // 128) * 128  # lane-align the patch-embed K axis
    wp = jnp.pad(params["patch_w"].astype(jnp.float32), ((0, CPPp - CPP), (0, 0)))

    lora_scale = cfg["lora_alpha"] / cfg["lora_rank"]
    attn_scale = 1.0 / (Dh ** 0.5)

    prep = {
        "patch_w": wp.astype(jnp.bfloat16),
        "patch_b": params["patch_b"].astype(jnp.float32),
        "pos": params["pos"].astype(jnp.float32),
        "layers": [],
    }
    for li, lp in enumerate(params["layers"]):
        scale = lora_scale if li >= cfg["start_lora_layer"] else 0.0
        wq, bq = _fold_lora(*lp["q"], scale)
        wk, bk = _fold_lora(*lp["k"], scale)
        wv, bv = _fold_lora(*lp["v"], scale)
        wo, bo = _fold_lora(*lp["attn_out"], scale)
        w1, b1 = _fold_lora(*lp["fc1"], scale)
        w2, b2 = _fold_lora(*lp["fc2"], scale)
        # Fuse Q/K/V into one (D, 3D) weight (single MXU pass, lane-dense
        # output) and fold the 1/sqrt(Dh) attention scale into the Q columns.
        wqkv = jnp.concatenate([wq * attn_scale, wk, wv], axis=1)
        bqkv = jnp.concatenate([bq * attn_scale, bk, bv], axis=1)
        prep["layers"].append(dict(
            ln1_g=lp["ln1_g"], ln1_b=lp["ln1_b"],
            ln2_g=lp["ln2_g"], ln2_b=lp["ln2_b"],
            wqkv=wqkv.astype(jnp.bfloat16), bqkv=bqkv.astype(jnp.float32),
            wo=wo.astype(jnp.bfloat16), bo=bo,
            w1=w1.astype(jnp.bfloat16), b1=b1,
            w2=w2.astype(jnp.bfloat16), b2=b2,
        ))
    return prep


# ----------------------------------------------------------------------------
# main
# ----------------------------------------------------------------------------

if __name__ == "__main__":
    cfg = dict(
        image_size=(16, 16),
        patch=4,
        channels=3,
        hidden=32,
        mlp=64,
        num_heads=2,
        num_layers=2,
        hidden_states_layer=2,   # 0 = embeddings, 1..num_layers = layer outputs
        lora_rank=4,
        lora_alpha=8,
        start_lora_layer=0,
        layer_norm_eps=1e-12,    # HF ViT default
    )

    key = jax.random.PRNGKey(0)
    pkey, vkey = jax.random.split(key)
    raw_params = init_params(pkey, cfg)
    prep = prepare_inference_params(raw_params, cfg)

    B, T = 2, 2
    video = jax.random.normal(
        vkey, (B, T, cfg["channels"], cfg["image_size"][0], cfg["image_size"][1]),
        jnp.float32,
    )
    video_length = jnp.full((B,), T, jnp.int32)

    fwd = jax.jit(functools.partial(vitpose_lora_forward, cfg=cfg))
    out = fwd(video, video_length, prep)
    jax.block_until_ready(out.hidden_state)

    NP = (cfg["image_size"][0] // cfg["patch"]) * (cfg["image_size"][1] // cfg["patch"])
    assert out.hidden_state.shape == (B, T, NP, cfg["hidden"])
    assert out.hidden_state.dtype == jnp.float32
    assert bool(jnp.all(jnp.isfinite(out.hidden_state)))
    assert out.heatmaps is None
    print("KERNEL_OK")
</pallas_src>

<mosaic_0001>
module attributes {stable_mosaic.version = 11 : i64} {
  func.func @_patch_embed_kernel(%arg0: i32, %arg1: memref<2x16x128xbf16, #tpu.memory_space<vmem>>, %arg2: memref<128x32xbf16, #tpu.memory_space<vmem>>, %arg3: memref<1x32xf32, #tpu.memory_space<vmem>>, %arg4: memref<16x32xf32, #tpu.memory_space<vmem>>, %arg5: memref<2x16x32xf32, #tpu.memory_space<vmem>>) attributes {dimension_semantics = [#tpu.dimension_semantics<parallel>], iteration_bounds = array<i64: 2>, scalar_prefetch = 0 : i64, scratch_operands = 0 : i64, tpu.core_type = #tpu.core_type<tc>, window_params = [{transform_indices = @transform_0, window_bounds = array<i64: 2, 16, 128>}, {pipeline_mode = #tpu.pipeline_mode<synchronous>, transform_indices = @transform_1, window_bounds = array<i64: 128, 32>}, {pipeline_mode = #tpu.pipeline_mode<synchronous>, transform_indices = @transform_2, window_bounds = array<i64: 1, 32>}, {pipeline_mode = #tpu.pipeline_mode<synchronous>, transform_indices = @transform_3, window_bounds = array<i64: 16, 32>}, {transform_indices = @transform_4, window_bounds = array<i64: 2, 16, 32>}]} {
    %c0 = arith.constant 0 : index
    %c0_0 = arith.constant 0 : index
    %c0_1 = arith.constant 0 : index
    %0 = vector.load %arg1[%c0, %c0_0, %c0_1] : memref<2x16x128xbf16, #tpu.memory_space<vmem>>, vector<2x16x128xbf16>
    %1 = vector.shape_cast %0 : vector<2x16x128xbf16> to vector<32x128xbf16>
    %c0_2 = arith.constant 0 : index
    %c0_3 = arith.constant 0 : index
    %2 = vector.load %arg2[%c0_2, %c0_3] : memref<128x32xbf16, #tpu.memory_space<vmem>>, vector<128x32xbf16>
    %cst = arith.constant dense<0.000000e+00> : vector<32x32xf32>
    %3 = tpu.matmul %1, %2, %cst {dimension_numbers = #tpu.dot_dimension_numbers<[1], [0], [0], [1], [0, 0, 1, 1], [], []>} : vector<32x128xbf16>, vector<128x32xbf16>, vector<32x32xf32> -> vector<32x32xf32>
    %4 = vector.shape_cast %3 : vector<32x32xf32> to vector<2x16x32xf32>
    %c0_4 = arith.constant 0 : index
    %c0_5 = arith.constant 0 : index
    %5 = vector.load %arg3[%c0_4, %c0_5] : memref<1x32xf32, #tpu.memory_space<vmem>>, vector<1x32xf32>
    %6 = vector.shape_cast %5 : vector<1x32xf32> to vector<1x1x32xf32>
    %7 = vector.broadcast %6 : vector<1x1x32xf32> to vector<2x16x32xf32>
    %8 = arith.addf %4, %7 : vector<2x16x32xf32>
    %c0_6 = arith.constant 0 : index
    %c0_7 = arith.constant 0 : index
    %9 = vector.load %arg4[%c0_6, %c0_7] : memref<16x32xf32, #tpu.memory_space<vmem>>, vector<16x32xf32>
    %10 = vector.shape_cast %9 : vector<16x32xf32> to vector<1x16x32xf32>
    %11 = vector.broadcast %10 : vector<1x16x32xf32> to vector<2x16x32xf32>
    %12 = arith.addf %8, %11 : vector<2x16x32xf32>
    %c0_8 = arith.constant 0 : index
    %c0_9 = arith.constant 0 : index
    %c0_10 = arith.constant 0 : index
    %13 = vector.load %arg5[%c0_8, %c0_9, %c0_10] : memref<2x16x32xf32, #tpu.memory_space<vmem>>, vector<2x16x32xf32>
    tpu.vector_store %arg5[%c0_8, %c0_9, %c0_10], %12 {strides = array<i32>} : memref<2x16x32xf32, #tpu.memory_space<vmem>>, vector<2x16x32xf32>,
    return
  }
  func.func @transform_0(%arg0: i32) -> (i32, i32, i32) {
    %c0_i32 = arith.constant 0 : i32
    %c0_i32_0 = arith.constant 0 : i32
    %c0_i32_1 = arith.constant 0 : i32
    return %arg0, %c0_i32, %c0_i32_0 : i32, i32, i32
  }
  func.func @transform_1(%arg0: i32) -> (i32, i32) {
    %c0_i32 = arith.constant 0 : i32
    %c0_i32_0 = arith.constant 0 : i32
    %c0_i32_1 = arith.constant 0 : i32
    return %c0_i32, %c0_i32_0 : i32, i32
  }
  func.func @transform_2(%arg0: i32) -> (i32, i32) {
    %c0_i32 = arith.constant 0 : i32
    %c0_i32_0 = arith.constant 0 : i32
    %c0_i32_1 = arith.constant 0 : i32
    return %c0_i32, %c0_i32_0 : i32, i32
  }
  func.func @transform_3(%arg0: i32) -> (i32, i32) {
    %c0_i32 = arith.constant 0 : i32
    %c0_i32_0 = arith.constant 0 : i32
    %c0_i32_1 = arith.constant 0 : i32
    return %c0_i32, %c0_i32_0 : i32, i32
  }
  func.func @transform_4(%arg0: i32) -> (i32, i32, i32) {
    %c0_i32 = arith.constant 0 : i32
    %c0_i32_0 = arith.constant 0 : i32
    %c0_i32_1 = arith.constant 0 : i32
    return %arg0, %c0_i32, %c0_i32_0 : i32, i32, i32
  }
}

module attributes {stable_mosaic.version = 11 : i64} {
  func.func @_ln1_attn_block_kernel(%arg0: i32, %arg1: memref<1x16x32xf32, #tpu.memory_space<vmem>>, %arg2: memref<1x32xf32, #tpu.memory_space<vmem>>, %arg3: memref<1x32xf32, #tpu.memory_space<vmem>>, %arg4: memref<32x96xbf16, #tpu.memory_space<vmem>>, %arg5: memref<1x96xf32, #tpu.memory_space<vmem>>, %arg6: memref<32x32xbf16, #tpu.memory_space<vmem>>, %arg7: memref<1x32xf32, #tpu.memory_space<vmem>>, %arg8: memref<1x16x32xf32, #tpu.memory_space<vmem>>, %arg9: memref<2x16x16xbf16, #tpu.memory_space<vmem>>, %arg10: memref<2x16x16xbf16, #tpu.memory_space<vmem>>, %arg11: memref<2x16x16xbf16, #tpu.memory_space<vmem>>, %arg12: memref<16x32xbf16, #tpu.memory_space<vmem>>) attributes {dimension_semantics = [#tpu.dimension_semantics<parallel>], iteration_bounds = array<i64: 4>, scalar_prefetch = 0 : i64, scratch_operands = 4 : i64, tpu.core_type = #tpu.core_type<tc>, window_params = [{transform_indices = @transform_0, window_bounds = array<i64: 1, 16, 32>}, {pipeline_mode = #tpu.pipeline_mode<synchronous>, transform_indices = @transform_1, window_bounds = array<i64: 1, 32>}, {pipeline_mode = #tpu.pipeline_mode<synchronous>, transform_indices = @transform_2, window_bounds = array<i64: 1, 32>}, {pipeline_mode = #tpu.pipeline_mode<synchronous>, transform_indices = @transform_3, window_bounds = array<i64: 32, 96>}, {pipeline_mode = #tpu.pipeline_mode<synchronous>, transform_indices = @transform_4, window_bounds = array<i64: 1, 96>}, {pipeline_mode = #tpu.pipeline_mode<synchronous>, transform_indices = @transform_5, window_bounds = array<i64: 32, 32>}, {pipeline_mode = #tpu.pipeline_mode<synchronous>, transform_indices = @transform_6, window_bounds = array<i64: 1, 32>}, {transform_indices = @transform_7, window_bounds = array<i64: 1, 16, 32>}]} {
    %c0 = arith.constant 0 : index
    %c0_0 = arith.constant 0 : index
    %c0_1 = arith.constant 0 : index
    %0 = vector.load %arg1[%c0, %c0_0, %c0_1] : memref<1x16x32xf32, #tpu.memory_space<vmem>>, vector<1x16x32xf32>
    %1 = vector.shape_cast %0 : vector<1x16x32xf32> to vector<16x32xf32>
    %c0_2 = arith.constant 0 : index
    %c0_3 = arith.constant 0 : index
    %2 = vector.load %arg2[%c0_2, %c0_3] : memref<1x32xf32, #tpu.memory_space<vmem>>, vector<1x32xf32>
    %c0_4 = arith.constant 0 : index
    %c0_5 = arith.constant 0 : index
    %3 = vector.load %arg3[%c0_4, %c0_5] : memref<1x32xf32, #tpu.memory_space<vmem>>, vector<1x32xf32>
    %cst = arith.constant dense<0.000000e+00> : vector<16xf32>
    %4 = vector.multi_reduction <add>, %1, %cst [1] : vector<16x32xf32> to vector<16xf32>
    %5 = vector.shape_cast %4 : vector<16xf32> to vector<16x1xf32>
    %cst_6 = arith.constant 3.200000e+01 : f32
    %6 = vector.broadcast %cst_6 : f32 to vector<16x1xf32>
    %7 = arith.divf %5, %6 : vector<16x1xf32>
    %8 = vector.broadcast %7 : vector<16x1xf32> to vector<16x32xf32>
    %9 = arith.subf %1, %8 : vector<16x32xf32>
    %10 = arith.mulf %9, %9 : vector<16x32xf32>
    %cst_7 = arith.constant dense<0.000000e+00> : vector<16xf32>
    %11 = vector.multi_reduction <add>, %10, %cst_7 [1] : vector<16x32xf32> to vector<16xf32>
    %12 = vector.shape_cast %11 : vector<16xf32> to vector<16x1xf32>
    %cst_8 = arith.constant 3.200000e+01 : f32
    %13 = vector.broadcast %cst_8 : f32 to vector<16x1xf32>
    %14 = arith.divf %12, %13 : vector<16x1xf32>
    %15 = vector.broadcast %7 : vector<16x1xf32> to vector<16x32xf32>
    %16 = arith.subf %1, %15 : vector<16x32xf32>
    %cst_9 = arith.constant 9.99999996E-13 : f32
    %17 = vector.broadcast %cst_9 : f32 to vector<16x1xf32>
    %18 = arith.addf %14, %17 : vector<16x1xf32>
    %19 = math.rsqrt %18 : vector<16x1xf32>
    %20 = vector.broadcast %19 : vector<16x1xf32> to vector<16x32xf32>
    %21 = arith.mulf %16, %20 : vector<16x32xf32>
    %22 = vector.broadcast %2 : vector<1x32xf32> to vector<16x32xf32>
    %23 = arith.mulf %21, %22 : vector<16x32xf32>
    %24 = vector.broadcast %3 : vector<1x32xf32> to vector<16x32xf32>
    %25 = arith.addf %23, %24 : vector<16x32xf32>
    %26 = arith.truncf %25 : vector<16x32xf32> to vector<16x32xbf16>
    %c0_10 = arith.constant 0 : index
    %c0_11 = arith.constant 0 : index
    %27 = vector.load %arg4[%c0_10, %c0_11] : memref<32x96xbf16, #tpu.memory_space<vmem>>, vector<32x96xbf16>
    %cst_12 = arith.constant dense<0.000000e+00> : vector<16x96xf32>
    %28 = tpu.matmul %26, %27, %cst_12 {dimension_numbers = #tpu.dot_dimension_numbers<[1], [0], [0], [1], [0, 0, 1, 1], [], []>} : vector<16x32xbf16>, vector<32x96xbf16>, vector<16x96xf32> -> vector<16x96xf32>
    %c0_13 = arith.constant 0 : index
    %c0_14 = arith.constant 0 : index
    %29 = vector.load %arg5[%c0_13, %c0_14] : memref<1x96xf32, #tpu.memory_space<vmem>>, vector<1x96xf32>
    %30 = vector.broadcast %29 : vector<1x96xf32> to vector<16x96xf32>
    %31 = arith.addf %28, %30 : vector<16x96xf32>
    %32 = vector.extract_strided_slice %31 {offsets = [0, 0], sizes = [16, 16], strides = [1, 1]} : vector<16x96xf32> to vector<16x16xf32>
    %33 = arith.truncf %32 : vector<16x16xf32> to vector<16x16xbf16>
    %c0_15 = arith.constant 0 : index
    %c0_16 = arith.constant 0 : index
    %c0_17 = arith.constant 0 : index
    %34 = vector.load %arg9[%c0_15, %c0_16, %c0_17] : memref<2x16x16xbf16, #tpu.memory_space<vmem>>, vector<1x16x16xbf16>
    %35 = vector.shape_cast %34 : vector<1x16x16xbf16> to vector<16x16xbf16>
    %36 = vector.shape_cast %33 : vector<16x16xbf16> to vector<1x16x16xbf16>
    tpu.vector_store %arg9[%c0_15, %c0_16, %c0_17], %36 {strides = array<i32>} : memref<2x16x16xbf16, #tpu.memory_space<vmem>>, vector<1x16x16xbf16>,
    %37 = vector.extract_strided_slice %31 {offsets = [0, 32], sizes = [16, 16], strides = [1, 1]} : vector<16x96xf32> to vector<16x16xf32>
    %38 = arith.truncf %37 : vector<16x16xf32> to vector<16x16xbf16>
    %c0_18 = arith.constant 0 : index
    %c0_19 = arith.constant 0 : index
    %c0_20 = arith.constant 0 : index
    %39 = vector.load %arg10[%c0_18, %c0_19, %c0_20] : memref<2x16x16xbf16, #tpu.memory_space<vmem>>, vector<1x16x16xbf16>
    %40 = vector.shape_cast %39 : vector<1x16x16xbf16> to vector<16x16xbf16>
    %41 = vector.shape_cast %38 : vector<16x16xbf16> to vector<1x16x16xbf16>
    tpu.vector_store %arg10[%c0_18, %c0_19, %c0_20], %41 {strides = array<i32>} : memref<2x16x16xbf16, #tpu.memory_space<vmem>>, vector<1x16x16xbf16>,
    %42 = vector.extract_strided_slice %31 {offsets = [0, 64], sizes = [16, 16], strides = [1, 1]} : vector<16x96xf32> to vector<16x16xf32>
    %43 = arith.truncf %42 : vector<16x16xf32> to vector<16x16xbf16>
    %c0_21 = arith.constant 0 : index
    %c0_22 = arith.constant 0 : index
    %c0_23 = arith.constant 0 : index
    %44 = vector.load %arg11[%c0_21, %c0_22, %c0_23] : memref<2x16x16xbf16, #tpu.memory_space<vmem>>, vector<1x16x16xbf16>
    %45 = vector.shape_cast %44 : vector<1x16x16xbf16> to vector<16x16xbf16>
    %46 = vector.shape_cast %43 : vector<16x16xbf16> to vector<1x16x16xbf16>
    tpu.vector_store %arg11[%c0_21, %c0_22, %c0_23], %46 {strides = array<i32>} : memref<2x16x16xbf16, #tpu.memory_space<vmem>>, vector<1x16x16xbf16>,
    %47 = vector.extract_strided_slice %31 {offsets = [0, 16], sizes = [16, 16], strides = [1, 1]} : vector<16x96xf32> to vector<16x16xf32>
    %48 = arith.truncf %47 : vector<16x16xf32> to vector<16x16xbf16>
    %c1 = arith.constant 1 : index
    %c0_24 = arith.constant 0 : index
    %c0_25 = arith.constant 0 : index
    %49 = vector.load %arg9[%c1, %c0_24, %c0_25] : memref<2x16x16xbf16, #tpu.memory_space<vmem>>, vector<1x16x16xbf16>
    %50 = vector.shape_cast %49 : vector<1x16x16xbf16> to vector<16x16xbf16>
    %51 = vector.shape_cast %48 : vector<16x16xbf16> to vector<1x16x16xbf16>
    tpu.vector_store %arg9[%c1, %c0_24, %c0_25], %51 {strides = array<i32>} : memref<2x16x16xbf16, #tpu.memory_space<vmem>>, vector<1x16x16xbf16>,
    %52 = vector.extract_strided_slice %31 {offsets = [0, 48], sizes = [16, 16], strides = [1, 1]} : vector<16x96xf32> to vector<16x16xf32>
    %53 = arith.truncf %52 : vector<16x16xf32> to vector<16x16xbf16>
    %c1_26 = arith.constant 1 : index
    %c0_27 = arith.constant 0 : index
    %c0_28 = arith.constant 0 : index
    %54 = vector.load %arg10[%c1_26, %c0_27, %c0_28] : memref<2x16x16xbf16, #tpu.memory_space<vmem>>, vector<1x16x16xbf16>
    %55 = vector.shape_cast %54 : vector<1x16x16xbf16> to vector<16x16xbf16>
    %56 = vector.shape_cast %53 : vector<16x16xbf16> to vector<1x16x16xbf16>
    tpu.vector_store %arg10[%c1_26, %c0_27, %c0_28], %56 {strides = array<i32>} : memref<2x16x16xbf16, #tpu.memory_space<vmem>>, vector<1x16x16xbf16>,
    %57 = vector.extract_strided_slice %31 {offsets = [0, 80], sizes = [16, 16], strides = [1, 1]} : vector<16x96xf32> to vector<16x16xf32>
    %58 = arith.truncf %57 : vector<16x16xf32> to vector<16x16xbf16>
    %c1_29 = arith.constant 1 : index
    %c0_30 = arith.constant 0 : index
    %c0_31 = arith.constant 0 : index
    %59 = vector.load %arg11[%c1_29, %c0_30, %c0_31] : memref<2x16x16xbf16, #tpu.memory_space<vmem>>, vector<1x16x16xbf16>
    %60 = vector.shape_cast %59 : vector<1x16x16xbf16> to vector<16x16xbf16>
    %61 = vector.shape_cast %58 : vector<16x16xbf16> to vector<1x16x16xbf16>
    tpu.vector_store %arg11[%c1_29, %c0_30, %c0_31], %61 {strides = array<i32>} : memref<2x16x16xbf16, #tpu.memory_space<vmem>>, vector<1x16x16xbf16>,
    %c0_32 = arith.constant 0 : index
    %c0_33 = arith.constant 0 : index
    %c0_34 = arith.constant 0 : index
    %62 = vector.load %arg9[%c0_32, %c0_33, %c0_34] : memref<2x16x16xbf16, #tpu.memory_space<vmem>>, vector<2x16x16xbf16>
    %c0_35 = arith.constant 0 : index
    %c0_36 = arith.constant 0 : index
    %c0_37 = arith.constant 0 : index
    %63 = vector.load %arg10[%c0_35, %c0_36, %c0_37] : memref<2x16x16xbf16, #tpu.memory_space<vmem>>, vector<2x16x16xbf16>
    "tpu.trace_start"() <{level = 10 : i32, message = "hqd,hkd->hqk"}> : () -> ()
    %cst_38 = arith.constant dense<0.000000e+00> : vector<2x16x16xf32>
    %64 = tpu.matmul %62, %63, %cst_38 {dimension_numbers = #tpu.dot_dimension_numbers<[2], [2], [1], [1], [0, 0, 0, 1, 1, 1], [0], [0]>} : vector<2x16x16xbf16>, vector<2x16x16xbf16>, vector<2x16x16xf32> -> vector<2x16x16xf32>
    "tpu.trace_stop"() : () -> ()
    %cst_39 = arith.constant dense<0xFF800000> : vector<2x16xf32>
    %65 = vector.multi_reduction <maximumf>, %64, %cst_39 [2] : vector<2x16x16xf32> to vector<2x16xf32>
    %66 = vector.shape_cast %65 : vector<2x16xf32> to vector<2x16x1xf32>
    %67 = vector.broadcast %66 : vector<2x16x1xf32> to vector<2x16x16xf32>
    %68 = arith.subf %64, %67 : vector<2x16x16xf32>
    %69 = math.exp %68 : vector<2x16x16xf32>
    %cst_40 = arith.constant dense<0.000000e+00> : vector<2x16xf32>
    %70 = vector.multi_reduction <add>, %69, %cst_40 [2] : vector<2x16x16xf32> to vector<2x16xf32>
    %71 = vector.shape_cast %70 : vector<2x16xf32> to vector<2x16x1xf32>
    %72 = tpu.reciprocal %71 {approx = true} : vector<2x16x1xf32> -> vector<2x16x1xf32>
    %73 = vector.broadcast %72 : vector<2x16x1xf32> to vector<2x16x16xf32>
    %74 = arith.mulf %69, %73 : vector<2x16x16xf32>
    %75 = arith.truncf %74 : vector<2x16x16xf32> to vector<2x16x16xbf16>
    %c0_41 = arith.constant 0 : index
    %c0_42 = arith.constant 0 : index
    %c0_43 = arith.constant 0 : index
    %76 = vector.load %arg11[%c0_41, %c0_42, %c0_43] : memref<2x16x16xbf16, #tpu.memory_space<vmem>>, vector<2x16x16xbf16>
    "tpu.trace_start"() <{level = 10 : i32, message = "hqk,hkd->hqd"}> : () -> ()
    %cst_44 = arith.constant dense<0.000000e+00> : vector<2x16x16xf32>
    %77 = tpu.matmul %75, %76, %cst_44 {dimension_numbers = #tpu.dot_dimension_numbers<[2], [1], [1], [2], [0, 0, 0, 1, 1, 2], [0], [0]>} : vector<2x16x16xbf16>, vector<2x16x16xbf16>, vector<2x16x16xf32> -> vector<2x16x16xf32>
    "tpu.trace_stop"() : () -> ()
    %78 = vector.extract_strided_slice %77 {offsets = [0, 0, 0], sizes = [1, 16, 16], strides = [1, 1, 1]} : vector<2x16x16xf32> to vector<1x16x16xf32>
    %79 = vector.shape_cast %78 : vector<1x16x16xf32> to vector<16x16xf32>
    %80 = arith.truncf %79 : vector<16x16xf32> to vector<16x16xbf16>
    %c0_45 = arith.constant 0 : index
    %c0_46 = arith.constant 0 : index
    %81 = vector.load %arg12[%c0_45, %c0_46] : memref<16x32xbf16, #tpu.memory_space<vmem>>, vector<16x16xbf16>
    tpu.vector_store %arg12[%c0_45, %c0_46], %80 {strides = array<i32>} : memref<16x32xbf16, #tpu.memory_space<vmem>>, vector<16x16xbf16>,
    %82 = vector.extract_strided_slice %77 {offsets = [1, 0, 0], sizes = [1, 16, 16], strides = [1, 1, 1]} : vector<2x16x16xf32> to vector<1x16x16xf32>
    %83 = vector.shape_cast %82 : vector<1x16x16xf32> to vector<16x16xf32>
    %84 = arith.truncf %83 : vector<16x16xf32> to vector<16x16xbf16>
    %c0_47 = arith.constant 0 : index
    %c16 = arith.constant 16 : index
    %85 = vector.load %arg12[%c0_47, %c16] : memref<16x32xbf16, #tpu.memory_space<vmem>>, vector<16x16xbf16>
    tpu.vector_store %arg12[%c0_47, %c16], %84 {strides = array<i32>} : memref<16x32xbf16, #tpu.memory_space<vmem>>, vector<16x16xbf16>,
    %c0_48 = arith.constant 0 : index
    %c0_49 = arith.constant 0 : index
    %86 = vector.load %arg12[%c0_48, %c0_49] : memref<16x32xbf16, #tpu.memory_space<vmem>>, vector<16x32xbf16>
    %c0_50 = arith.constant 0 : index
    %c0_51 = arith.constant 0 : index
    %87 = vector.load %arg6[%c0_50, %c0_51] : memref<32x32xbf16, #tpu.memory_space<vmem>>, vector<32x32xbf16>
    %cst_52 = arith.constant dense<0.000000e+00> : vector<16x32xf32>
    %88 = tpu.matmul %86, %87, %cst_52 {dimension_numbers = #tpu.dot_dimension_numbers<[1], [0], [0], [1], [0, 0, 1, 1], [], []>} : vector<16x32xbf16>, vector<32x32xbf16>, vector<16x32xf32> -> vector<16x32xf32>
    %89 = arith.addf %1, %88 : vector<16x32xf32>
    %c0_53 = arith.constant 0 : index
    %c0_54 = arith.constant 0 : index
    %90 = vector.load %arg7[%c0_53, %c0_54] : memref<1x32xf32, #tpu.memory_space<vmem>>, vector<1x32xf32>
    %91 = vector.broadcast %90 : vector<1x32xf32> to vector<16x32xf32>
    %92 = arith.addf %89, %91 : vector<16x32xf32>
    %c0_55 = arith.constant 0 : index
    %c0_56 = arith.constant 0 : index
    %c0_57 = arith.constant 0 : index
    %93 = vector.load %arg8[%c0_55, %c0_56, %c0_57] : memref<1x16x32xf32, #tpu.memory_space<vmem>>, vector<1x16x32xf32>
    %94 = vector.shape_cast %93 : vector<1x16x32xf32> to vector<16x32xf32>
    %95 = vector.shape_cast %92 : vector<16x32xf32> to vector<1x16x32xf32>
    tpu.vector_store %arg8[%c0_55, %c0_56, %c0_57], %95 {strides = array<i32>} : memref<1x16x32xf32, #tpu.memory_space<vmem>>, vector<1x16x32xf32>,
    return
  }
  func.func @transform_0(%arg0: i32) -> (i32, i32, i32) {
    %c0_i32 = arith.constant 0 : i32
    %c0_i32_0 = arith.constant 0 : i32
    %c0_i32_1 = arith.constant 0 : i32
    return %arg0, %c0_i32, %c0_i32_0 : i32, i32, i32
  }
  func.func @transform_1(%arg0: i32) -> (i32, i32) {
    %c0_i32 = arith.constant 0 : i32
    %c0_i32_0 = arith.constant 0 : i32
    %c0_i32_1 = arith.constant 0 : i32
    return %c0_i32, %c0_i32_0 : i32, i32
  }
  func.func @transform_2(%arg0: i32) -> (i32, i32) {
    %c0_i32 = arith.constant 0 : i32
    %c0_i32_0 = arith.constant 0 : i32
    %c0_i32_1 = arith.constant 0 : i32
    return %c0_i32, %c0_i32_0 : i32, i32
  }
  func.func @transform_3(%arg0: i32) -> (i32, i32) {
    %c0_i32 = arith.constant 0 : i32
    %c0_i32_0 = arith.constant 0 : i32
    %c0_i32_1 = arith.constant 0 : i32
    return %c0_i32, %c0_i32_0 : i32, i32
  }
  func.func @transform_4(%arg0: i32) -> (i32, i32) {
    %c0_i32 = arith.constant 0 : i32
    %c0_i32_0 = arith.constant 0 : i32
    %c0_i32_1 = arith.constant 0 : i32
    return %c0_i32, %c0_i32_0 : i32, i32
  }
  func.func @transform_5(%arg0: i32) -> (i32, i32) {
    %c0_i32 = arith.constant 0 : i32
    %c0_i32_0 = arith.constant 0 : i32
    %c0_i32_1 = arith.constant 0 : i32
    return %c0_i32, %c0_i32_0 : i32, i32
  }
  func.func @transform_6(%arg0: i32) -> (i32, i32) {
    %c0_i32 = arith.constant 0 : i32
    %c0_i32_0 = arith.constant 0 : i32
    %c0_i32_1 = arith.constant 0 : i32
    return %c0_i32, %c0_i32_0 : i32, i32
  }
  func.func @transform_7(%arg0: i32) -> (i32, i32, i32) {
    %c0_i32 = arith.constant 0 : i32
    %c0_i32_0 = arith.constant 0 : i32
    %c0_i32_1 = arith.constant 0 : i32
    return %arg0, %c0_i32, %c0_i32_0 : i32, i32, i32
  }
}

module attributes {stable_mosaic.version = 11 : i64} {
  func.func @_ln_mlp_residual_kernel(%arg0: i32, %arg1: memref<32x32xf32, #tpu.memory_space<vmem>>, %arg2: memref<1x32xf32, #tpu.memory_space<vmem>>, %arg3: memref<1x32xf32, #tpu.memory_space<vmem>>, %arg4: memref<32x64xbf16, #tpu.memory_space<vmem>>, %arg5: memref<1x64xf32, #tpu.memory_space<vmem>>, %arg6: memref<64x32xbf16, #tpu.memory_space<vmem>>, %arg7: memref<1x32xf32, #tpu.memory_space<vmem>>, %arg8: memref<32x32xf32, #tpu.memory_space<vmem>>) attributes {dimension_semantics = [#tpu.dimension_semantics<parallel>], iteration_bounds = array<i64: 2>, scalar_prefetch = 0 : i64, scratch_operands = 0 : i64, tpu.core_type = #tpu.core_type<tc>, window_params = [{transform_indices = @transform_0, window_bounds = array<i64: 32, 32>}, {pipeline_mode = #tpu.pipeline_mode<synchronous>, transform_indices = @transform_1, window_bounds = array<i64: 1, 32>}, {pipeline_mode = #tpu.pipeline_mode<synchronous>, transform_indices = @transform_2, window_bounds = array<i64: 1, 32>}, {pipeline_mode = #tpu.pipeline_mode<synchronous>, transform_indices = @transform_3, window_bounds = array<i64: 32, 64>}, {pipeline_mode = #tpu.pipeline_mode<synchronous>, transform_indices = @transform_4, window_bounds = array<i64: 1, 64>}, {pipeline_mode = #tpu.pipeline_mode<synchronous>, transform_indices = @transform_5, window_bounds = array<i64: 64, 32>}, {pipeline_mode = #tpu.pipeline_mode<synchronous>, transform_indices = @transform_6, window_bounds = array<i64: 1, 32>}, {transform_indices = @transform_7, window_bounds = array<i64: 32, 32>}]} {
    %c0 = arith.constant 0 : index
    %c0_0 = arith.constant 0 : index
    %0 = vector.load %arg1[%c0, %c0_0] : memref<32x32xf32, #tpu.memory_space<vmem>>, vector<32x32xf32>
    %c0_1 = arith.constant 0 : index
    %c0_2 = arith.constant 0 : index
    %1 = vector.load %arg2[%c0_1, %c0_2] : memref<1x32xf32, #tpu.memory_space<vmem>>, vector<1x32xf32>
    %c0_3 = arith.constant 0 : index
    %c0_4 = arith.constant 0 : index
    %2 = vector.load %arg3[%c0_3, %c0_4] : memref<1x32xf32, #tpu.memory_space<vmem>>, vector<1x32xf32>
    %cst = arith.constant dense<0.000000e+00> : vector<32xf32>
    %3 = vector.multi_reduction <add>, %0, %cst [1] : vector<32x32xf32> to vector<32xf32>
    %4 = vector.shape_cast %3 : vector<32xf32> to vector<32x1xf32>
    %cst_5 = arith.constant 3.200000e+01 : f32
    %5 = vector.broadcast %cst_5 : f32 to vector<32x1xf32>
    %6 = arith.divf %4, %5 : vector<32x1xf32>
    %7 = vector.broadcast %6 : vector<32x1xf32> to vector<32x32xf32>
    %8 = arith.subf %0, %7 : vector<32x32xf32>
    %9 = arith.mulf %8, %8 : vector<32x32xf32>
    %cst_6 = arith.constant dense<0.000000e+00> : vector<32xf32>
    %10 = vector.multi_reduction <add>, %9, %cst_6 [1] : vector<32x32xf32> to vector<32xf32>
    %11 = vector.shape_cast %10 : vector<32xf32> to vector<32x1xf32>
    %cst_7 = arith.constant 3.200000e+01 : f32
    %12 = vector.broadcast %cst_7 : f32 to vector<32x1xf32>
    %13 = arith.divf %11, %12 : vector<32x1xf32>
    %14 = vector.broadcast %6 : vector<32x1xf32> to vector<32x32xf32>
    %15 = arith.subf %0, %14 : vector<32x32xf32>
    %cst_8 = arith.constant 9.99999996E-13 : f32
    %16 = vector.broadcast %cst_8 : f32 to vector<32x1xf32>
    %17 = arith.addf %13, %16 : vector<32x1xf32>
    %18 = math.rsqrt %17 : vector<32x1xf32>
    %19 = vector.broadcast %18 : vector<32x1xf32> to vector<32x32xf32>
    %20 = arith.mulf %15, %19 : vector<32x32xf32>
    %21 = vector.broadcast %1 : vector<1x32xf32> to vector<32x32xf32>
    %22 = arith.mulf %20, %21 : vector<32x32xf32>
    %23 = vector.broadcast %2 : vector<1x32xf32> to vector<32x32xf32>
    %24 = arith.addf %22, %23 : vector<32x32xf32>
    %25 = arith.truncf %24 : vector<32x32xf32> to vector<32x32xbf16>
    %c0_9 = arith.constant 0 : index
    %c0_10 = arith.constant 0 : index
    %26 = vector.load %arg4[%c0_9, %c0_10] : memref<32x64xbf16, #tpu.memory_space<vmem>>, vector<32x64xbf16>
    %cst_11 = arith.constant dense<0.000000e+00> : vector<32x64xf32>
    %27 = tpu.matmul %25, %26, %cst_11 {dimension_numbers = #tpu.dot_dimension_numbers<[1], [0], [0], [1], [0, 0, 1, 1], [], []>} : vector<32x32xbf16>, vector<32x64xbf16>, vector<32x64xf32> -> vector<32x64xf32>
    %c0_12 = arith.constant 0 : index
    %c0_13 = arith.constant 0 : index
    %28 = vector.load %arg5[%c0_12, %c0_13] : memref<1x64xf32, #tpu.memory_space<vmem>>, vector<1x64xf32>
    %29 = vector.broadcast %28 : vector<1x64xf32> to vector<32x64xf32>
    %30 = arith.addf %27, %29 : vector<32x64xf32>
    %31 = arith.mulf %30, %30 : vector<32x64xf32>
    %32 = arith.mulf %30, %31 : vector<32x64xf32>
    %cst_14 = arith.constant 4.471500e-02 : f32
    %33 = vector.broadcast %cst_14 : f32 to vector<32x64xf32>
    %34 = arith.mulf %33, %32 : vector<32x64xf32>
    %35 = arith.addf %30, %34 : vector<32x64xf32>
    %cst_15 = arith.constant 0.797884583 : f32
    %36 = vector.broadcast %cst_15 : f32 to vector<32x64xf32>
    %37 = arith.mulf %36, %35 : vector<32x64xf32>
    %38 = math.tanh %37 : vector<32x64xf32>
    %cst_16 = arith.constant 1.000000e+00 : f32
    %39 = vector.broadcast %cst_16 : f32 to vector<32x64xf32>
    %40 = arith.addf %39, %38 : vector<32x64xf32>
    %cst_17 = arith.constant 5.000000e-01 : f32
    %41 = vector.broadcast %cst_17 : f32 to vector<32x64xf32>
    %42 = arith.mulf %41, %40 : vector<32x64xf32>
    %43 = arith.mulf %30, %42 : vector<32x64xf32>
    %44 = arith.truncf %43 : vector<32x64xf32> to vector<32x64xbf16>
    %c0_18 = arith.constant 0 : index
    %c0_19 = arith.constant 0 : index
    %45 = vector.load %arg6[%c0_18, %c0_19] : memref<64x32xbf16, #tpu.memory_space<vmem>>, vector<64x32xbf16>
    %cst_20 = arith.constant dense<0.000000e+00> : vector<32x32xf32>
    %46 = tpu.matmul %44, %45, %cst_20 {dimension_numbers = #tpu.dot_dimension_numbers<[1], [0], [0], [1], [0, 0, 1, 1], [], []>} : vector<32x64xbf16>, vector<64x32xbf16>, vector<32x32xf32> -> vector<32x32xf32>
    %47 = arith.addf %0, %46 : vector<32x32xf32>
    %c0_21 = arith.constant 0 : index
    %c0_22 = arith.constant 0 : index
    %48 = vector.load %arg7[%c0_21, %c0_22] : memref<1x32xf32, #tpu.memory_space<vmem>>, vector<1x32xf32>
    %49 = vector.broadcast %48 : vector<1x32xf32> to vector<32x32xf32>
    %50 = arith.addf %47, %49 : vector<32x32xf32>
    %c0_23 = arith.constant 0 : index
    %c0_24 = arith.constant 0 : index
    %51 = vector.load %arg8[%c0_23, %c0_24] : memref<32x32xf32, #tpu.memory_space<vmem>>, vector<32x32xf32>
    tpu.vector_store %arg8[%c0_23, %c0_24], %50 {strides = array<i32>} : memref<32x32xf32, #tpu.memory_space<vmem>>, vector<32x32xf32>,
    return
  }
  func.func @transform_0(%arg0: i32) -> (i32, i32) {
    %c0_i32 = arith.constant 0 : i32
    %c0_i32_0 = arith.constant 0 : i32
    return %arg0, %c0_i32 : i32, i32
  }
  func.func @transform_1(%arg0: i32) -> (i32, i32) {
    %c0_i32 = arith.constant 0 : i32
    %c0_i32_0 = arith.constant 0 : i32
    %c0_i32_1 = arith.constant 0 : i32
    return %c0_i32, %c0_i32_0 : i32, i32
  }
  func.func @transform_2(%arg0: i32) -> (i32, i32) {
    %c0_i32 = arith.constant 0 : i32
    %c0_i32_0 = arith.constant 0 : i32
    %c0_i32_1 = arith.constant 0 : i32
    return %c0_i32, %c0_i32_0 : i32, i32
  }
  func.func @transform_3(%arg0: i32) -> (i32, i32) {
    %c0_i32 = arith.constant 0 : i32
    %c0_i32_0 = arith.constant 0 : i32
    %c0_i32_1 = arith.constant 0 : i32
    return %c0_i32, %c0_i32_0 : i32, i32
  }
  func.func @transform_4(%arg0: i32) -> (i32, i32) {
    %c0_i32 = arith.constant 0 : i32
    %c0_i32_0 = arith.constant 0 : i32
    %c0_i32_1 = arith.constant 0 : i32
    return %c0_i32, %c0_i32_0 : i32, i32
  }
  func.func @transform_5(%arg0: i32) -> (i32, i32) {
    %c0_i32 = arith.constant 0 : i32
    %c0_i32_0 = arith.constant 0 : i32
    %c0_i32_1 = arith.constant 0 : i32
    return %c0_i32, %c0_i32_0 : i32, i32
  }
  func.func @transform_6(%arg0: i32) -> (i32, i32) {
    %c0_i32 = arith.constant 0 : i32
    %c0_i32_0 = arith.constant 0 : i32
    %c0_i32_1 = arith.constant 0 : i32
    return %c0_i32, %c0_i32_0 : i32, i32
  }
  func.func @transform_7(%arg0: i32) -> (i32, i32) {
    %c0_i32 = arith.constant 0 : i32
    %c0_i32_0 = arith.constant 0 : i32
    return %arg0, %c0_i32 : i32, i32
  }
}

module attributes {stable_mosaic.version = 11 : i64} {
  func.func @_ln_mlp_residual_kernel(%arg0: i32, %arg1: memref<32x32xf32, #tpu.memory_space<vmem>>, %arg2: memref<1x32xf32, #tpu.memory_space<vmem>>, %arg3: memref<1x32xf32, #tpu.memory_space<vmem>>, %arg4: memref<32x64xbf16, #tpu.memory_space<vmem>>, %arg5: memref<1x64xf32, #tpu.memory_space<vmem>>, %arg6: memref<64x32xbf16, #tpu.memory_space<vmem>>, %arg7: memref<1x32xf32, #tpu.memory_space<vmem>>, %arg8: memref<32x32xf32, #tpu.memory_space<vmem>>) attributes {dimension_semantics = [#tpu.dimension_semantics<parallel>], iteration_bounds = array<i64: 2>, scalar_prefetch = 0 : i64, scratch_operands = 0 : i64, tpu.core_type = #tpu.core_type<tc>, window_params = [{transform_indices = @transform_0, window_bounds = array<i64: 32, 32>}, {pipeline_mode = #tpu.pipeline_mode<synchronous>, transform_indices = @transform_1, window_bounds = array<i64: 1, 32>}, {pipeline_mode = #tpu.pipeline_mode<synchronous>, transform_indices = @transform_2, window_bounds = array<i64: 1, 32>}, {pipeline_mode = #tpu.pipeline_mode<synchronous>, transform_indices = @transform_3, window_bounds = array<i64: 32, 64>}, {pipeline_mode = #tpu.pipeline_mode<synchronous>, transform_indices = @transform_4, window_bounds = array<i64: 1, 64>}, {pipeline_mode = #tpu.pipeline_mode<synchronous>, transform_indices = @transform_5, window_bounds = array<i64: 64, 32>}, {pipeline_mode = #tpu.pipeline_mode<synchronous>, transform_indices = @transform_6, window_bounds = array<i64: 1, 32>}, {transform_indices = @transform_7, window_bounds = array<i64: 32, 32>}]} {
    %c0 = arith.constant 0 : index
    %c0_0 = arith.constant 0 : index
    %0 = vector.load %arg1[%c0, %c0_0] : memref<32x32xf32, #tpu.memory_space<vmem>>, vector<32x32xf32>
    %c0_1 = arith.constant 0 : index
    %c0_2 = arith.constant 0 : index
    %1 = vector.load %arg2[%c0_1, %c0_2] : memref<1x32xf32, #tpu.memory_space<vmem>>, vector<1x32xf32>
    %c0_3 = arith.constant 0 : index
    %c0_4 = arith.constant 0 : index
    %2 = vector.load %arg3[%c0_3, %c0_4] : memref<1x32xf32, #tpu.memory_space<vmem>>, vector<1x32xf32>
    %cst = arith.constant dense<0.000000e+00> : vector<32xf32>
    %3 = vector.multi_reduction <add>, %0, %cst [1] : vector<32x32xf32> to vector<32xf32>
    %4 = vector.shape_cast %3 : vector<32xf32> to vector<32x1xf32>
    %cst_5 = arith.constant 3.200000e+01 : f32
    %5 = vector.broadcast %cst_5 : f32 to vector<32x1xf32>
    %6 = arith.divf %4, %5 : vector<32x1xf32>
    %7 = vector.broadcast %6 : vector<32x1xf32> to vector<32x32xf32>
    %8 = arith.subf %0, %7 : vector<32x32xf32>
    %9 = arith.mulf %8, %8 : vector<32x32xf32>
    %cst_6 = arith.constant dense<0.000000e+00> : vector<32xf32>
    %10 = vector.multi_reduction <add>, %9, %cst_6 [1] : vector<32x32xf32> to vector<32xf32>
    %11 = vector.shape_cast %10 : vector<32xf32> to vector<32x1xf32>
    %cst_7 = arith.constant 3.200000e+01 : f32
    %12 = vector.broadcast %cst_7 : f32 to vector<32x1xf32>
    %13 = arith.divf %11, %12 : vector<32x1xf32>
    %14 = vector.broadcast %6 : vector<32x1xf32> to vector<32x32xf32>
    %15 = arith.subf %0, %14 : vector<32x32xf32>
    %cst_8 = arith.constant 9.99999996E-13 : f32
    %16 = vector.broadcast %cst_8 : f32 to vector<32x1xf32>
    %17 = arith.addf %13, %16 : vector<32x1xf32>
    %18 = math.rsqrt %17 : vector<32x1xf32>
    %19 = vector.broadcast %18 : vector<32x1xf32> to vector<32x32xf32>
    %20 = arith.mulf %15, %19 : vector<32x32xf32>
    %21 = vector.broadcast %1 : vector<1x32xf32> to vector<32x32xf32>
    %22 = arith.mulf %20, %21 : vector<32x32xf32>
    %23 = vector.broadcast %2 : vector<1x32xf32> to vector<32x32xf32>
    %24 = arith.addf %22, %23 : vector<32x32xf32>
    %25 = arith.truncf %24 : vector<32x32xf32> to vector<32x32xbf16>
    %c0_9 = arith.constant 0 : index
    %c0_10 = arith.constant 0 : index
    %26 = vector.load %arg4[%c0_9, %c0_10] : memref<32x64xbf16, #tpu.memory_space<vmem>>, vector<32x64xbf16>
    %cst_11 = arith.constant dense<0.000000e+00> : vector<32x64xf32>
    %27 = tpu.matmul %25, %26, %cst_11 {dimension_numbers = #tpu.dot_dimension_numbers<[1], [0], [0], [1], [0, 0, 1, 1], [], []>} : vector<32x32xbf16>, vector<32x64xbf16>, vector<32x64xf32> -> vector<32x64xf32>
    %c0_12 = arith.constant 0 : index
    %c0_13 = arith.constant 0 : index
    %28 = vector.load %arg5[%c0_12, %c0_13] : memref<1x64xf32, #tpu.memory_space<vmem>>, vector<1x64xf32>
    %29 = vector.broadcast %28 : vector<1x64xf32> to vector<32x64xf32>
    %30 = arith.addf %27, %29 : vector<32x64xf32>
    %31 = arith.mulf %30, %30 : vector<32x64xf32>
    %32 = arith.mulf %30, %31 : vector<32x64xf32>
    %cst_14 = arith.constant 4.471500e-02 : f32
    %33 = vector.broadcast %cst_14 : f32 to vector<32x64xf32>
    %34 = arith.mulf %33, %32 : vector<32x64xf32>
    %35 = arith.addf %30, %34 : vector<32x64xf32>
    %cst_15 = arith.constant 0.797884583 : f32
    %36 = vector.broadcast %cst_15 : f32 to vector<32x64xf32>
    %37 = arith.mulf %36, %35 : vector<32x64xf32>
    %38 = math.tanh %37 : vector<32x64xf32>
    %cst_16 = arith.constant 1.000000e+00 : f32
    %39 = vector.broadcast %cst_16 : f32 to vector<32x64xf32>
    %40 = arith.addf %39, %38 : vector<32x64xf32>
    %cst_17 = arith.constant 5.000000e-01 : f32
    %41 = vector.broadcast %cst_17 : f32 to vector<32x64xf32>
    %42 = arith.mulf %41, %40 : vector<32x64xf32>
    %43 = arith.mulf %30, %42 : vector<32x64xf32>
    %44 = arith.truncf %43 : vector<32x64xf32> to vector<32x64xbf16>
    %c0_18 = arith.constant 0 : index
    %c0_19 = arith.constant 0 : index
    %45 = vector.load %arg6[%c0_18, %c0_19] : memref<64x32xbf16, #tpu.memory_space<vmem>>, vector<64x32xbf16>
    %cst_20 = arith.constant dense<0.000000e+00> : vector<32x32xf32>
    %46 = tpu.matmul %44, %45, %cst_20 {dimension_numbers = #tpu.dot_dimension_numbers<[1], [0], [0], [1], [0, 0, 1, 1], [], []>} : vector<32x64xbf16>, vector<64x32xbf16>, vector<32x32xf32> -> vector<32x32xf32>
    %47 = arith.addf %0, %46 : vector<32x32xf32>
    %c0_21 = arith.constant 0 : index
    %c0_22 = arith.constant 0 : index
    %48 = vector.load %arg7[%c0_21, %c0_22] : memref<1x32xf32, #tpu.memory_space<vmem>>, vector<1x32xf32>
    %49 = vector.broadcast %48 : vector<1x32xf32> to vector<32x32xf32>
    %50 = arith.addf %47, %49 : vector<32x32xf32>
    %c0_23 = arith.constant 0 : index
    %c0_24 = arith.constant 0 : index
    %51 = vector.load %arg8[%c0_23, %c0_24] : memref<32x32xf32, #tpu.memory_space<vmem>>, vector<32x32xf32>
    tpu.vector_store %arg8[%c0_23, %c0_24], %50 {strides = array<i32>} : memref<32x32xf32, #tpu.memory_space<vmem>>, vector<32x32xf32>,
    return
  }
  func.func @transform_0(%arg0: i32) -> (i32, i32) {
    %c0_i32 = arith.constant 0 : i32
    %c0_i32_0 = arith.constant 0 : i32
    return %arg0, %c0_i32 : i32, i32
  }
  func.func @transform_1(%arg0: i32) -> (i32, i32) {
    %c0_i32 = arith.constant 0 : i32
    %c0_i32_0 = arith.constant 0 : i32
    %c0_i32_1 = arith.constant 0 : i32
    return %c0_i32, %c0_i32_0 : i32, i32
  }
  func.func @transform_2(%arg0: i32) -> (i32, i32) {
    %c0_i32 = arith.constant 0 : i32
    %c0_i32_0 = arith.constant 0 : i32
    %c0_i32_1 = arith.constant 0 : i32
    return %c0_i32, %c0_i32_0 : i32, i32
  }
  func.func @transform_3(%arg0: i32) -> (i32, i32) {
    %c0_i32 = arith.constant 0 : i32
    %c0_i32_0 = arith.constant 0 : i32
    %c0_i32_1 = arith.constant 0 : i32
    return %c0_i32, %c0_i32_0 : i32, i32
  }
  func.func @transform_4(%arg0: i32) -> (i32, i32) {
    %c0_i32 = arith.constant 0 : i32
    %c0_i32_0 = arith.constant 0 : i32
    %c0_i32_1 = arith.constant 0 : i32
    return %c0_i32, %c0_i32_0 : i32, i32
  }
  func.func @transform_5(%arg0: i32) -> (i32, i32) {
    %c0_i32 = arith.constant 0 : i32
    %c0_i32_0 = arith.constant 0 : i32
    %c0_i32_1 = arith.constant 0 : i32
    return %c0_i32, %c0_i32_0 : i32, i32
  }
  func.func @transform_6(%arg0: i32) -> (i32, i32) {
    %c0_i32 = arith.constant 0 : i32
    %c0_i32_0 = arith.constant 0 : i32
    %c0_i32_1 = arith.constant 0 : i32
    return %c0_i32, %c0_i32_0 : i32, i32
  }
  func.func @transform_7(%arg0: i32) -> (i32, i32) {
    %c0_i32 = arith.constant 0 : i32
    %c0_i32_0 = arith.constant 0 : i32
    return %arg0, %c0_i32 : i32, i32
  }
}

</mosaic_0001>

<bundles_post_ra>
// kernel: vitpose_lora_forward.5
= control target key start
LH: loop header
LB: loop body
LE: loop exit
PB: predicated region body
PF: predicated region fallthrough
CT: control target
= control target key end

     0   :  { %s523_s15 = smov 0   ;;  %s577_s0 = inlined_call_operand.vmem [shape: bf16[4,16,128], index: 0, kind: input, shape index: {}]   ;;  %s578_s1 = inlined_call_operand.vmem [shape: bf16[128,32], index: 1, kind: input, shape index: {}]   ;;  %s579_s2 = inlined_call_operand.vmem [shape: f32[1,32], index: 2, kind: input, shape index: {}]   ;;  %s580_s3 = inlined_call_operand.vmem [shape: f32[16,32], index: 3, kind: input, shape index: {}]   ;;  %s581_s4 = inlined_call_operand.vmem [shape: f32[4,16,32], index: 4, kind: output, shape index: {}]  }
   0x1 LB: > { %s416_s16 = sadd.s32 4294967295, %s496_s15   ;;  %p420_p0 = scmp.ge.s32.totalorder %s496_s15, 1  ;;  %s496_s15 = sphi %s523_s15, %s14_s15  }
   0x2   : > { %p164_p1 = scmp.lt.s32.totalorder %s496_s15, 3 }
   0x4   : > { %p165_p2 = pnand %p420_p0, %p164_p1 }
   0x5   : > { %s421_s19 = sshll.u32 (!%p165_p2), %s416_s16, 1 }
   0x6   : > { %168 = sbr.rel (%p165_p2) target bundleno = 248 (0xf8), region = 36  ;;  %p193_p3 = scmp.lt.s32.totalorder (!%p165_p2), %s421_s19, 3 }
   0xb   : > { %v480_v0 = vld [vmem:[%s578_s1 + $0x38] sm:$0xff]   ;;  %v481_v1 = vld [vmem:[%s578_s1 + $0x30] sm:$0xff]   ;;  %s583_s19 = smov (!%p193_p3, %s421_s19), 3  ;;  %v482_v2 = vld [vmem:[%s578_s1 + $0x28] sm:$0xff]   ;;  %vm353_vm0 = vcmask 261120  }
   0xc   : > { %452 = vmatprep.subr.bf16.mxu0 %v480_v0  ;;  %s440_s24 = sshll.u32 %s583_s19, 3  ;;  %v483_v3 = vld [vmem:[%s578_s1 + $0x20] sm:$0xff]   ;;  %v484_v5 = vld [vmem:[%s578_s1 + $0x18] sm:$0xff]   ;;  %v485_v6 = vld [vmem:[%s578_s1 + $0x10] sm:$0xff]   ;;  %s441_s14 = sshll.u32 %s583_s19, 4 }
   0xd   : > { %453 = vmatpush3.bf16.msra.mxu0 %v480_v0  ;;  %s197_s27 = scalar_lea.vmem %s577_s0, %s440_s24  ;;  %v486_v7 = vld [vmem:[%s578_s1 + $0x8] sm:$0xff]   ;;  %v487_v8 = vld [vmem:[%s578_s1] sm:$0xff]   ;;  %s204_s21 = scalar_lea.vmem %s581_s4, %s441_s14 }
   0xe   : > { %454 = vmatprep.subr.bf16.mxu0 %v481_v1  ;;  %v488_v4 = vld [vmem:[%s197_s27] sm:$0xff]   ;;  %v489_v9 = vld [vmem:[%s197_s27 + $0x8] sm:$0xff]  }
   0xf   : > { %468 = vmatprep.mubr.bf16.mxu0 %v488_v4  ;;  %v437_v10 = vld [vmem:[%s579_s2] ss:$0 sm:$0xff]  ;;  %v348_v21 = vld [vmem:[%s580_s3 + $0x8] sm:$0xff] }
  0x10   : > { %v347_v14 = vld [vmem:[%s580_s3] sm:$0xff] }
  0x11   : > { %455 = vmatpush3.bf16.msra.mxu0 %v481_v1 }
  0x12   : > { %456 = vmatprep.subr.bf16.mxu0 %v482_v2 }
  0x15   : > { %457 = vmatpush3.bf16.msra.mxu0 %v482_v2 }
  0x16   : > { %458 = vmatprep.subr.bf16.mxu0 %v483_v3 }
  0x19   : > { %459 = vmatpush3.bf16.msra.mxu0 %v483_v3 }
  0x1a   : > { %460 = vmatprep.subr.bf16.mxu0 %v484_v5 }
  0x1d   : > { %461 = vmatpush3.bf16.msra.mxu0 %v484_v5 }
  0x1e   : > { %462 = vmatprep.subr.bf16.mxu0 %v485_v6 }
  0x21   : > { %463 = vmatpush3.bf16.msra.mxu0 %v485_v6 }
  0x22   : > { %464 = vmatprep.subr.bf16.mxu0 %v486_v7 }
  0x25   : > { %465 = vmatpush3.bf16.msra.mxu0 %v486_v7 }
  0x26   : > { %466 = vmatprep.subr.bf16.mxu0 %v487_v8 }
  0x29   : > { %467 = vmatpush3.bf16.msra.mxu0 %v487_v8 }
  0x2c   : > { %469 = vmatmul.mubr.bf16.vlgmr.msra.gmra.mxu0 %v489_v9 }
  0xec   : > { %v470_v11 = vpop.f32.mrf.mxu0 }
  0xed   : > { %v345_v12 = vadd.f32 %v470_v11, %v437_v10 }
  0xee   : > { %v321_v13 = vpop.f32.mrf.mxu0 }
  0xef   : > { %v343_v15 = vadd.f32 %v437_v10, %v321_v13  ;;  %v351_v18 = vadd.f32 %v347_v14, %v345_v12 }
  0xf0   : > { %v471_v16 = vpop.f32.mrf.mxu0 }
  0xf1   : > { %v349_v17 = vadd.f32 %v347_v14, %v343_v15  ;;  %v346_v19 = vadd.f32 %v471_v16, %v437_v10  ;;  %356 = vst.msk [vmem:[%s204_s21 + $0x10] sm:$0xff] %vm353_vm0, %v351_v18 }
  0xf2   : > { %v324_v20 = vpop.f32.mrf.mxu0 }
  0xf3   : > { %354 = vst.msk [vmem:[%s204_s21] sm:$0xff] %vm353_vm0, %v349_v17  ;;  %v344_v22 = vadd.f32 %v437_v10, %v324_v20  ;;  %v352_v24 = vadd.f32 %v348_v21, %v346_v19 }
  0xf5   : > { %v350_v23 = vadd.f32 %v348_v21, %v344_v22  ;;  %357 = vst.msk [vmem:[%s204_s21 + $0x18] sm:$0xff] %vm353_vm0, %v352_v24 }
  0xf7   : > { %355 = vst.msk [vmem:[%s204_s21 + $0x8] sm:$0xff] %vm353_vm0, %v350_v23 }
  0xf8 PF: > { %s14_s15 = sadd.s32 1, %s496_s15  }
  0xf9   : > { %p11_p4 = scmp.ge.s32.totalorder %s14_s15, 4  }
  0xfb   :  { %13 = sbr.rel (!%p11_p4) target bundleno = 1 (0x1), region = 66 }

// kernel: vitpose_lora_forward.9
= control target key start
LH: loop header
LB: loop body
LE: loop exit
PB: predicated region body
PF: predicated region fallthrough
CT: control target
= control target key end

     0   :  { %12 = vsyncpa [#allocation3], 0  ;;  %s1052_s0 = inlined_call_operand.vmem [shape: f32[64,32], index: 0, kind: input, shape index: {}]   ;;  %s1053_s1 = inlined_call_operand.vmem [shape: f32[1,32], index: 1, kind: input, shape index: {}]   ;;  %s1054_s2 = inlined_call_operand.vmem [shape: f32[1,32], index: 2, kind: input, shape index: {}]   ;;  %s1055_s3 = inlined_call_operand.vmem [shape: bf16[32,64], index: 3, kind: input, shape index: {}]   ;;  %s1056_s4 = inlined_call_operand.vmem [shape: f32[1,64], index: 4, kind: input, shape index: {}]   ;;  %s1057_s5 = inlined_call_operand.vmem [shape: bf16[64,32], index: 5, kind: input, shape index: {}]   ;;  %s1058_s6 = inlined_call_operand.vmem [shape: f32[1,32], index: 6, kind: input, shape index: {}]   ;;  %s1059_s7 = inlined_call_operand.hbm [shape: f32[64,32], index: 7, kind: output, shape index: {}]  }
   0x1   :  { %14 = vsyncpa [#allocation3 + $0x1], 0  ;;  %s887_s24 = smov 0   ;;  %s889_s25 = smov 0  }
   0x2   :  { %s891_s26 = smov 0   ;;  %s893_s27 = smov 0  }
   0x3 LB: > { %s908_s28 = sadd.s32 4294967295, %s842_s27   ;;  %s662_s29 = sadd.s32 4294967294, %s842_s27   ;;  %s842_s27 = sphi %s893_s27, %s1065_s27   ;;  %s838_s26 = sphi %s891_s26, %s1064_s26   ;;  %s834_s25 = sphi %s889_s25, %s1063_s25   ;;  %s830_s24 = sphi %s887_s24, %s1062_s24  }
   0x4   : > { %s912_s30 = sadd.s32 1, %s842_s27   ;;  %s179_s8 = sadd.s32 1, %s838_s26 }
   0x5   : > { %s176_s9 = ssub.s32 %s842_s27, %s912_s30  ;;  %p189_p0 = scmp.ne.s32.totalorder %s838_s26, %s834_s25 }
   0x6   : > { %p177_p1 = scmp.eq.s32.totalorder %s176_s9, 0  ;;  %p190_p2 = scmp.eq.s32.totalorder %s908_s28, 1 }
   0x7   : > { %p195_p3 = scmp.ne.s32.totalorder %s834_s25, %s830_s24  ;;  %p196_p4 = scmp.eq.s32.totalorder %s662_s29, 1 }
   0x8   : > { %s923_s10 = scalar_select %p177_p1, %s838_s26, %s179_s8  }
   0x9   : > { %p925_p5 = por %p190_p2, %p189_p0  ;;  %p929_p6 = por %p196_p4, %p195_p3 }
   0xa   : > { %p665_p7 = scmp.ge.s32.totalorder %s842_s27, 1  ;;  %p241_p8 = scmp.lt.s32.totalorder %s842_s27, 3 }
   0xc   : > { %p242_p9 = pnand %p665_p7, %p241_p8 }
   0xd   : > { %s667_s13 = sshll.u32 (!%p242_p9), %s908_s28, 2  ;;  %s270_s22 = sand.u32 (!%p242_p9), 1, %s834_s25  }
   0xe   : > { %245 = sbr.rel (%p242_p9) target bundleno = 792 (0x318), region = 48  ;;  %p274_p10 = scmp.lt.s32.totalorder (!%p242_p9), %s667_s13, 7 }
   0xf   : > { %s666_s23 = sshll.u32 (!%p242_p9), %s270_s22, 5  ;;  %s844_s19 = smov (!%p242_p9), [#allocation2]  }
  0x10   : > { %s272_s9 = scalar_lea.vmem (!%p242_p9), [#allocation2], %s666_s23  ;;  %s786_s20 = sshll.u32 (!%p242_p9), %s844_s19, 4  ;;  %s787_s20 = int_to_ptr.vmem [resolvable:$false] %s786_s20 }
  0x11   : > { %s788_s21 = scalar_lea.vmem (!%p242_p9), %s787_s20, 1024 }
  0x13   : > { %s1067_s13 = smov (!%p274_p10, %s667_s13), 7  ;;  %vm287_vm0 = vcmask 261120   ;;  %v760_v28 = vld [vmem:[%s1055_s3 + $0x8] sm:$0xff]   ;;  %v761_v29 = vld [vmem:[%s1055_s3] sm:$0xff]   ;;  %v762_v62 = vld [vmem:[%s1057_s5 + $0x18] sm:$0xff]   ;;  %vm511_vm1 = vcmask 523264  }
  0x14   : > { %s668_s14 = sshll.u32 %s1067_s13, 3  ;;  %699 = vmatprep.subr.bf16.mxu0 %v760_v28  ;;  %v669_v44 = vld [vmem:[%s1053_s1] ss:$0 sm:$0xff]  ;;  %707 = vmatprep.subr.bf16.mxu1 %v762_v62  ;;  %v763_v63 = vld [vmem:[%s1057_s5 + $0x10] sm:$0xff]   ;;  %s600_s13 = sshll.u32 %s272_s9, 4  ;;  %s1008_s13 = int_to_ptr.vmem [resolvable:$true] %s600_s13 }
  0x15   : > { %s277_s17 = scalar_lea.vmem %s1052_s0, %s668_s14  ;;  %700 = vmatpush3.bf16.msra.mxu0 %v760_v28  ;;  %v670_v49 = vld [vmem:[%s1054_s2] ss:$0 sm:$0xff]  ;;  %708 = vmatpush3.bf16.msra.mxu1 %v762_v62  ;;  %s688_s14 = sshll.u32 %s908_s28, 9 }
  0x16   : > { %v939_v0 = vld [vmem:[%s277_s17] sm:$0xff]  ;;  %v941_v1 = vld [vmem:[%s277_s17 + $0x10] sm:$0xff]  ;;  %v943_v2 = vld [vmem:[%s277_s17 + $0x8] sm:$0xff]  ;;  %701 = vmatprep.subr.bf16.mxu0 %v761_v29  ;;  %709 = vmatprep.subr.bf16.mxu1 %v763_v63  ;;  %s1012_s28 = scalar_lea.sflag [#allocation3], %s270_s22  ;;  %s782_s18 = scalar_lea.vmem %s1008_s13, 512 }
  0x17   : > { %v288_v3 = vsel %vm287_vm0, %v939_v0, 0.0  ;;  %v294_v4 = vsel %vm287_vm0, %v941_v1, 0.0  ;;  %v949_v5 = vld [vmem:[%s277_s17 + $0x18] sm:$0xff]  ;;  %v291_v6 = vsel %vm287_vm0, %v943_v2, 0.0  ;;  %s1006_s17 = scalar_lea.hbm %s1059_s7, %s688_s14  ;;  %p783_p11 = scmp.ne.s32.totalorder %s1008_s13, %s782_s18 }
  0x18   : > { %289 = vadd.xlane.f32.xlu0 %v288_v3  ;;  %295 = vadd.xlane.f32.xlu1 %v294_v4  ;;  %v297_v7 = vsel %vm287_vm0, %v949_v5, 0.0  ;;  %v764_v3 = vld [vmem:[%s1057_s5 + $0x8] sm:$0xff]   ;;  %v765_v4 = vld [vmem:[%s1057_s5] sm:$0xff]   ;;  %p789_p0 = scmp.lt.s32.totalorder %s1008_s13, %s787_s20  ;;  %p790_p1 = scmp.lt.s32.totalorder %s788_s21, %s782_s18 }
  0x19   : > { %702 = vmatpush3.bf16.msra.mxu0 %v761_v29  ;;  %710 = vmatpush3.bf16.msra.mxu1 %v763_v63  ;;  %p784_p12 = pnand %p783_p11, %p925_p5 }
  0x1a   : > { %711 = vmatprep.subr.bf16.mxu1 %v764_v3  ;;  %p791_p2 = por %p790_p1, %p789_p0 }
  0x1b   : > { %p785_p13 = pneg %p784_p12 }
  0x1c   : > { %292 = vadd.xlane.f32.xlu0 %v291_v6  ;;  %298 = vadd.xlane.f32.xlu1 %v297_v7  ;;  %v671_v6 = vld [vmem:[%s1056_s4] ss:$0 sm:$0xff] }
  0x1d   : > { %712 = vmatpush3.bf16.msra.mxu1 %v764_v3  ;;  %p792_p3 = pnand %p791_p2, %p785_p13 }
  0x1e   : > { %713 = vmatprep.subr.bf16.mxu1 %v765_v4 }
  0x21   : > { %714 = vmatpush3.bf16.msra.mxu1 %v765_v4 }
  0xa1   : > { %v290_v8 = vpop.xlane.xlu0 %289  ;;  %v296_v9 = vpop.xlane.xlu1 %295 }
  0xa2   : > { %v301_v10 = vmul.f32 0.03125, %v290_v8  ;;  %v303_v11 = vmul.f32 0.03125, %v296_v9 }
  0xa4   : > { %v305_v12 = vsub.f32 %v939_v0, %v301_v10  ;;  %v307_v13 = vsub.f32 %v941_v1, %v303_v11 }
  0xa5   : > { %v293_v14 = vpop.xlane.xlu0 %292  ;;  %v299_v15 = vpop.xlane.xlu1 %298 }
  0xa6   : > { %v302_v16 = vmul.f32 0.03125, %v293_v14  ;;  %v304_v17 = vmul.f32 0.03125, %v299_v15  ;;  %v309_v18 = vmul.f32 %v305_v12, %v305_v12  ;;  %v311_v19 = vmul.f32 %v307_v13, %v307_v13 }
  0xa8   : > { %v306_v20 = vsub.f32 %v943_v2, %v302_v16  ;;  %v308_v21 = vsub.f32 %v949_v5, %v304_v17  ;;  %v313_v22 = vsel %vm287_vm0, %v309_v18, 0.0  ;;  %v319_v23 = vsel %vm287_vm0, %v311_v19, 0.0 }
  0xa9   : > { %314 = vadd.xlane.f32.xlu0 %v313_v22 }
  0xaa   : > { %v310_v24 = vmul.f32 %v306_v20, %v306_v20  ;;  %v312_v25 = vmul.f32 %v308_v21, %v308_v21 }
  0xac   : > { %v316_v26 = vsel %vm287_vm0, %v310_v24, 0.0  ;;  %v322_v27 = vsel %vm287_vm0, %v312_v25, 0.0 }
  0xad   : > { %320 = vadd.xlane.f32.xlu0 %v319_v23  ;;  %317 = vadd.xlane.f32.xlu1 %v316_v26 }
  0xb1   : > { %323 = vadd.xlane.f32.xlu1 %v322_v27 }
 0x132   : > { %v315_v30 = vpop.xlane.xlu0 %314 }
 0x133   : > { %v325_v31 = vmul.f32 0.03125, %v315_v30 }
 0x135   : > { %v329_v32 = vadd.f32 1e-12, %v325_v31 }
 0x136   : > { %v318_v33 = vpop.xlane.xlu1 %317  ;;  %v321_v34 = vpop.xlane.xlu0 %320 }
 0x137   : > { %766 = vrsqrt.f32 %v329_v32  ;;  %v326_v35 = vmul.f32 0.03125, %v318_v33  ;;  %v327_v36 = vmul.f32 0.03125, %v321_v34 }
 0x139   : > { %v330_v37 = vadd.f32 1e-12, %v326_v35  ;;  %v331_v38 = vadd.f32 1e-12, %v327_v36 }
 0x13a   : > { %v324_v39 = vpop.xlane.xlu1 %323 }
 0x13b   : > { %768 = vrsqrt.f32 %v330_v37  ;;  %v328_v40 = vmul.f32 0.03125, %v324_v39 }
 0x13c   : > { %770 = vrsqrt.f32 %v331_v38 }
 0x13d   : > { %v332_v41 = vadd.f32 1e-12, %v328_v40 }
 0x13f   : > { %772 = vrsqrt.f32 %v332_v41 }
 0x144   : > { %v767_v42 = vpop.eup %766 }
 0x145   : > { %v337_v43 = vmul.f32 %v767_v42, %v305_v12 }
 0x147   : > { %v347_v48 = vmul.f32 %v669_v44, %v337_v43 }
 0x148   : > { %v769_v45 = vpop.eup %768 }
 0x149   : > { %v771_v46 = vpop.eup %770  ;;  %v338_v47 = vmul.f32 %v769_v45, %v306_v20  ;;  %v357_v53 = vadd.f32 %v670_v49, %v347_v48 }
 0x14a   : > { %v339_v50 = vmul.f32 %v771_v46, %v307_v13 }
 0x14b   : > { %v348_v51 = vmul.f32 %v669_v44, %v338_v47 }
 0x14c   : > { %v773_v52 = vpop.eup %772  ;;  %v349_v56 = vmul.f32 %v669_v44, %v339_v50 }
 0x14d   : > { %v358_v54 = vadd.f32 %v670_v49, %v348_v51  ;;  %v340_v55 = vmul.f32 %v773_v52, %v308_v21 }
 0x14e   : > { %v359_v59 = vadd.f32 %v670_v49, %v349_v56 }
 0x14f   : > { %v361_v57 = vpack.c.bf16 %v358_v54, %v357_v53  ;;  %v350_v58 = vmul.f32 %v669_v44, %v340_v55  ;;  %v682_v54 = vld [vmem:[%s1058_s6] ss:$0 sm:$0xff] }
 0x151   : > { %703 = vmatprep.mubr.msk.bf16.mxu0 %vm287_vm0, %v361_v57  ;;  %v360_v60 = vadd.f32 %v670_v49, %v350_v58 }
 0x153   : > { %v362_v61 = vpack.c.bf16 %v360_v60, %v359_v59 }
 0x155   : > { %704 = vmatmul.mubr.msk.bf16.vlgmr.msra.gmra.mxu0 %vm287_vm0, %v362_v61 }
 0x215   : > { %v705_v7 = vpop.f32.mrf.mxu0 }
 0x216   : > { %v435_v8 = vadd.f32 %v705_v7, %v671_v6 }
 0x217   : > { %v426_v9 = vpop.f32.mrf.mxu0 }
 0x218   : > { %v443_v10 = vmul.f32 %v435_v8, %v435_v8  ;;  %v427_v11 = vadd.f32 %v671_v6, %v426_v9 }
 0x219   : > { %v706_v12 = vpop.f32.mrf.mxu0 }
 0x21a   : > { %v447_v13 = vmul.f32 %v443_v10, %v435_v8  ;;  %v441_v14 = vmul.f32 %v427_v11, %v427_v11  ;;  %v438_v15 = vadd.f32 %v706_v12, %v671_v6 }
 0x21b   : > { %v429_v16 = vpop.f32.mrf.mxu0 }
 0x21c   : > { %v451_v17 = vmul.f32 0.044715, %v447_v13  ;;  %v445_v18 = vmul.f32 %v441_v14, %v427_v11  ;;  %v444_v19 = vmul.f32 %v438_v15, %v438_v15  ;;  %v430_v20 = vadd.f32 %v671_v6, %v429_v16 }
 0x21e   : > { %v455_v21 = vadd.f32 %v451_v17, %v435_v8  ;;  %v449_v22 = vmul.f32 0.044715, %v445_v18  ;;  %v448_v23 = vmul.f32 %v444_v19, %v438_v15  ;;  %v442_v24 = vmul.f32 %v430_v20, %v430_v20 }
 0x220   : > { %v459_v25 = vmul.f32 0.7978846, %v455_v21  ;;  %v453_v26 = vadd.f32 %v449_v22, %v427_v11  ;;  %v452_v27 = vmul.f32 0.044715, %v448_v23  ;;  %v446_v28 = vmul.f32 %v442_v24, %v430_v20 }
 0x222   : > { %v457_v29 = vmul.f32 0.7978846, %v453_v26  ;;  %v456_v30 = vadd.f32 %v452_v27, %v438_v15  ;;  %v450_v31 = vmul.f32 0.044715, %v446_v28  ;;  %774 = vtanh.f32 %v459_v25 }
 0x224   : > { %v460_v32 = vmul.f32 0.7978846, %v456_v30  ;;  %v454_v33 = vadd.f32 %v450_v31, %v430_v20  ;;  %776 = vtanh.f32 %v457_v29 }
 0x226   : > { %778 = vtanh.f32 %v460_v32  ;;  %v458_v34 = vmul.f32 0.7978846, %v454_v33 }
 0x228   : > { %780 = vtanh.f32 %v458_v34 }
 0x22f   : > { %v775_v35 = vpop.eup %774 }
 0x230   : > { %v467_v39 = vadd.f32 1.0, %v775_v35 }
 0x231   : > { %v777_v36 = vpop.eup %776 }
 0x232   : > { %v465_v37 = vadd.f32 1.0, %v777_v36  ;;  %v471_v45 = vmul.f32 0.5, %v467_v39 }
 0x233   : > { %v779_v38 = vpop.eup %778 }
 0x234   : > { %v468_v40 = vadd.f32 1.0, %v779_v38  ;;  %v469_v44 = vmul.f32 0.5, %v465_v37  ;;  %v475_v50 = vmul.f32 %v471_v45, %v435_v8 }
 0x235   : > { %v781_v41 = vpop.eup %780 }
 0x236   : > { %v472_v42 = vmul.f32 0.5, %v468_v40  ;;  %v466_v43 = vadd.f32 1.0, %v781_v41  ;;  %v473_v48 = vmul.f32 %v469_v44, %v427_v11 }
 0x238   : > { %v470_v46 = vmul.f32 0.5, %v466_v43  ;;  %v476_v47 = vmul.f32 %v472_v42, %v438_v15 }
 0x23a   : > { %v474_v49 = vmul.f32 %v470_v46, %v430_v20  ;;  %v478_v52 = vpack.c.bf16 %v476_v47, %v475_v50 }
 0x23c   : > { %v477_v51 = vpack.c.bf16 %v474_v49, %v473_v48 }
 0x23e   : > { %715 = vmatprep.mubr.msk.bf16.mxu1 %vm511_vm1, %v477_v51 }
 0x23f   : > { %716 = vmatmul.mubr.msk.bf16.vlgmr.msra.gmra.mxu1 %vm511_vm1, %v478_v52 }
 0x2ff   : > { %v717_v53 = vpop.f32.mrf.mxu1 }
 0x300   : > { %v569_v55 = vadd.f32 %v717_v53, %v941_v1 }
 0x301   : > { %v552_v56 = vpop.f32.mrf.mxu1 }
 0x302   : > { %v580_v57 = vadd.f32 %v682_v54, %v569_v55  ;;  %v567_v58 = vadd.f32 %v552_v56, %v939_v0 }
 0x303   : > { %v718_v59 = vpop.f32.mrf.mxu1 }
 0x304   : > { %584 = vst.msk [vmem:[%s272_s9 + $0x10] sm:$0xff] %vm287_vm0, %v580_v57  ;;  %v578_v60 = vadd.f32 %v682_v54, %v567_v58  ;;  %v570_v61 = vadd.f32 %v718_v59, %v949_v5 }
 0x305   : > { %v555_v62 = vpop.f32.mrf.mxu1 }
 0x306   : > { %582 = vst.msk [vmem:[%s272_s9] sm:$0xff] %vm287_vm0, %v578_v60  ;;  %v581_v63 = vadd.f32 %v682_v54, %v570_v61  ;;  %v568_v1 = vadd.f32 %v555_v62, %v943_v2 }
 0x308   : > { %585 = vst.msk [vmem:[%s272_s9 + $0x18] sm:$0xff] %vm287_vm0, %v581_v63  ;;  %v579_v0 = vadd.f32 %v682_v54, %v568_v1 }
 0x30a   : > { %583 = vst.msk [vmem:[%s272_s9 + $0x8] sm:$0xff] %vm287_vm0, %v579_v0 }
 0x30b   : > { %795 = shalt.err (!%p792_p3)
}
 0x30c   : > { %s796_s22 = scalar_lea.hbm %s1006_s17, 512  ;;  %s800_s8 = scalar_lea.hbm %s1059_s7, 1024 }
 0x30d   : > { %p797_p4 = scmp.ne.s32.totalorder %s1006_s17, %s796_s22  ;;  %p801_p9 = scmp.lt.s32.totalorder %s1006_s17, %s1059_s7 }
 0x30e   : > { %p802_p10 = scmp.lt.s32.totalorder %s800_s8, %s796_s22 }
 0x30f   : > { %p798_p7 = pnand %p797_p4, %p925_p5 }
 0x310   : > { %p803_p11 = por %p802_p10, %p801_p9 }
 0x311   : > { %p799_p8 = pneg %p798_p7 }
 0x313   : > { %p804_p12 = pnand %p803_p11, %p799_p8 }
 0x315   : > { %807 = shalt.err (!%p804_p12)
}
 0x316   : > { %s845_s15 = smov 128   ;;  %s846_s16 = smov 8  }
 0x317   : > { %719 = dma.vmem_to_hbm [thread:$0]  (%p925_p5), %s1008_s13, 512, %s1006_s17, %s1012_s28, %s845_s15, %s845_s15, %s846_s16  }
 0x318 PF: > { %p725_p13 = scmp.ge.s32.totalorder %s842_s27, 2  ;;  %s615_s18 = sand.u32 1, %s830_s24  }
 0x319   : > { %s616_s19 = scalar_lea.sflag [#allocation3], %s615_s18 }
 0x31a   : > { %p722_p0 = pnand %p725_p13, %p929_p6 }
 0x31c   : > { %p723_p1 = pneg %p722_p0 }
 0x31e   : > { %825 = dma.done.wait (%p723_p1), %s616_s19, 512  }
 0x31f   : > { %827 = vsyncadd (%p723_p1), %s616_s19, 4294966784  ;;  %p17_p2 = scmp.ge.s32.totalorder %s912_s30, 4   ;;  %s1062_s24 = smov %s834_s25 }
 0x320   : > { %s1063_s25 = smov %s838_s26  ;;  %s1064_s26 = smov %s923_s10 }
 0x321   : > { %s1065_s27 = smov %s912_s30  ;;  %19 = sbr.rel (!%p17_p2) target bundleno = 3 (0x3), region = 83 }
 0x326   :  { %621 = vsyncpa [#allocation3], 1 }
 0x327   :  { %623 = vsyncpa [#allocation3 + $0x1], 1 }

// kernel: vitpose_lora_forward.7
= control target key start
LH: loop header
LB: loop body
LE: loop exit
PB: predicated region body
PF: predicated region fallthrough
CT: control target
= control target key end

     0   :  { %s777_s24 = smov 0   ;;  %s865_s0 = inlined_call_operand.vmem [shape: f32[64,32], index: 0, kind: input, shape index: {}]   ;;  %s866_s1 = inlined_call_operand.vmem [shape: f32[1,32], index: 1, kind: input, shape index: {}]   ;;  %s867_s2 = inlined_call_operand.vmem [shape: f32[1,32], index: 2, kind: input, shape index: {}]   ;;  %s868_s3 = inlined_call_operand.vmem [shape: bf16[32,64], index: 3, kind: input, shape index: {}]   ;;  %s869_s4 = inlined_call_operand.vmem [shape: f32[1,64], index: 4, kind: input, shape index: {}]   ;;  %s870_s5 = inlined_call_operand.vmem [shape: bf16[64,32], index: 5, kind: input, shape index: {}]   ;;  %s871_s6 = inlined_call_operand.vmem [shape: f32[1,32], index: 6, kind: input, shape index: {}]   ;;  %s872_s7 = inlined_call_operand.vmem [shape: f32[64,32], index: 7, kind: output, shape index: {}]  }
   0x1 LB: > { %s644_s25 = sadd.s32 4294967295, %s735_s24   ;;  %p648_p0 = scmp.ge.s32.totalorder %s735_s24, 1  ;;  %s735_s24 = sphi %s777_s24, %s17_s24  }
   0x2   : > { %p238_p1 = scmp.lt.s32.totalorder %s735_s24, 3 }
   0x4   : > { %p239_p2 = pnand %p648_p0, %p238_p1 }
   0x5   : > { %s649_s26 = sshll.u32 (!%p239_p2), %s644_s25, 2 }
   0x6   : > { %242 = sbr.rel (%p239_p2) target bundleno = 771 (0x303), region = 48  ;;  %p271_p3 = scmp.lt.s32.totalorder (!%p239_p2), %s649_s26, 7 }
   0xb   : > { %s874_s26 = smov (!%p271_p3, %s649_s26), 7  ;;  %vm289_vm0 = vcmask 261120   ;;  %v707_v28 = vld [vmem:[%s868_s3 + $0x8] sm:$0xff]   ;;  %v708_v29 = vld [vmem:[%s868_s3] sm:$0xff]   ;;  %v709_v62 = vld [vmem:[%s870_s5 + $0x18] sm:$0xff]   ;;  %vm513_vm1 = vcmask 523264  }
   0xc   : > { %s650_s27 = sshll.u32 %s874_s26, 3  ;;  %679 = vmatprep.subr.bf16.mxu0 %v707_v28  ;;  %v653_v44 = vld [vmem:[%s866_s1] ss:$0 sm:$0xff]  ;;  %687 = vmatprep.subr.bf16.mxu1 %v709_v62  ;;  %v710_v63 = vld [vmem:[%s870_s5 + $0x10] sm:$0xff]  }
   0xd   : > { %s274_s30 = scalar_lea.vmem %s865_s0, %s650_s27  ;;  %680 = vmatpush3.bf16.msra.mxu0 %v707_v28  ;;  %v654_v49 = vld [vmem:[%s867_s2] ss:$0 sm:$0xff]  ;;  %688 = vmatpush3.bf16.msra.mxu1 %v709_v62  ;;  %s280_s8 = scalar_lea.vmem %s872_s7, %s650_s27 }
   0xe   : > { %v793_v0 = vld [vmem:[%s274_s30] sm:$0xff]  ;;  %v795_v1 = vld [vmem:[%s274_s30 + $0x10] sm:$0xff]  ;;  %v797_v2 = vld [vmem:[%s274_s30 + $0x8] sm:$0xff]  ;;  %681 = vmatprep.subr.bf16.mxu0 %v708_v29  ;;  %689 = vmatprep.subr.bf16.mxu1 %v710_v63 }
   0xf   : > { %v290_v3 = vsel %vm289_vm0, %v793_v0, 0.0  ;;  %v296_v4 = vsel %vm289_vm0, %v795_v1, 0.0  ;;  %v803_v5 = vld [vmem:[%s274_s30 + $0x18] sm:$0xff]  ;;  %v293_v6 = vsel %vm289_vm0, %v797_v2, 0.0 }
  0x10   : > { %291 = vadd.xlane.f32.xlu0 %v290_v3  ;;  %297 = vadd.xlane.f32.xlu1 %v296_v4  ;;  %v299_v7 = vsel %vm289_vm0, %v803_v5, 0.0  ;;  %v711_v3 = vld [vmem:[%s870_s5 + $0x8] sm:$0xff]   ;;  %v712_v4 = vld [vmem:[%s870_s5] sm:$0xff]  }
  0x11   : > { %682 = vmatpush3.bf16.msra.mxu0 %v708_v29  ;;  %690 = vmatpush3.bf16.msra.mxu1 %v710_v63 }
  0x12   : > { %691 = vmatprep.subr.bf16.mxu1 %v711_v3 }
  0x14   : > { %294 = vadd.xlane.f32.xlu0 %v293_v6  ;;  %300 = vadd.xlane.f32.xlu1 %v299_v7  ;;  %v655_v6 = vld [vmem:[%s869_s4] ss:$0 sm:$0xff] }
  0x15   : > { %692 = vmatpush3.bf16.msra.mxu1 %v711_v3 }
  0x16   : > { %693 = vmatprep.subr.bf16.mxu1 %v712_v4 }
  0x19   : > { %694 = vmatpush3.bf16.msra.mxu1 %v712_v4 }
  0x99   : > { %v292_v8 = vpop.xlane.xlu0 %291  ;;  %v298_v9 = vpop.xlane.xlu1 %297 }
  0x9a   : > { %v303_v10 = vmul.f32 0.03125, %v292_v8  ;;  %v305_v11 = vmul.f32 0.03125, %v298_v9 }
  0x9c   : > { %v307_v12 = vsub.f32 %v793_v0, %v303_v10  ;;  %v309_v13 = vsub.f32 %v795_v1, %v305_v11 }
  0x9d   : > { %v295_v14 = vpop.xlane.xlu0 %294  ;;  %v301_v15 = vpop.xlane.xlu1 %300 }
  0x9e   : > { %v304_v16 = vmul.f32 0.03125, %v295_v14  ;;  %v306_v17 = vmul.f32 0.03125, %v301_v15  ;;  %v311_v18 = vmul.f32 %v307_v12, %v307_v12  ;;  %v313_v19 = vmul.f32 %v309_v13, %v309_v13 }
  0xa0   : > { %v308_v20 = vsub.f32 %v797_v2, %v304_v16  ;;  %v310_v21 = vsub.f32 %v803_v5, %v306_v17  ;;  %v315_v22 = vsel %vm289_vm0, %v311_v18, 0.0  ;;  %v321_v23 = vsel %vm289_vm0, %v313_v19, 0.0 }
  0xa1   : > { %316 = vadd.xlane.f32.xlu0 %v315_v22 }
  0xa2   : > { %v312_v24 = vmul.f32 %v308_v20, %v308_v20  ;;  %v314_v25 = vmul.f32 %v310_v21, %v310_v21 }
  0xa4   : > { %v318_v26 = vsel %vm289_vm0, %v312_v24, 0.0  ;;  %v324_v27 = vsel %vm289_vm0, %v314_v25, 0.0 }
  0xa5   : > { %322 = vadd.xlane.f32.xlu0 %v321_v23  ;;  %319 = vadd.xlane.f32.xlu1 %v318_v26 }
  0xa9   : > { %325 = vadd.xlane.f32.xlu1 %v324_v27 }
 0x12a   : > { %v317_v30 = vpop.xlane.xlu0 %316 }
 0x12b   : > { %v327_v31 = vmul.f32 0.03125, %v317_v30 }
 0x12d   : > { %v331_v32 = vadd.f32 1e-12, %v327_v31 }
 0x12e   : > { %v320_v33 = vpop.xlane.xlu1 %319  ;;  %v323_v34 = vpop.xlane.xlu0 %322 }
 0x12f   : > { %713 = vrsqrt.f32 %v331_v32  ;;  %v328_v35 = vmul.f32 0.03125, %v320_v33  ;;  %v329_v36 = vmul.f32 0.03125, %v323_v34 }
 0x131   : > { %v332_v37 = vadd.f32 1e-12, %v328_v35  ;;  %v333_v38 = vadd.f32 1e-12, %v329_v36 }
 0x132   : > { %v326_v39 = vpop.xlane.xlu1 %325 }
 0x133   : > { %715 = vrsqrt.f32 %v332_v37  ;;  %v330_v40 = vmul.f32 0.03125, %v326_v39 }
 0x134   : > { %717 = vrsqrt.f32 %v333_v38 }
 0x135   : > { %v334_v41 = vadd.f32 1e-12, %v330_v40 }
 0x137   : > { %719 = vrsqrt.f32 %v334_v41 }
 0x13c   : > { %v714_v42 = vpop.eup %713 }
 0x13d   : > { %v339_v43 = vmul.f32 %v714_v42, %v307_v12 }
 0x13f   : > { %v349_v48 = vmul.f32 %v653_v44, %v339_v43 }
 0x140   : > { %v716_v45 = vpop.eup %715 }
 0x141   : > { %v718_v46 = vpop.eup %717  ;;  %v340_v47 = vmul.f32 %v716_v45, %v308_v20  ;;  %v359_v53 = vadd.f32 %v654_v49, %v349_v48 }
 0x142   : > { %v341_v50 = vmul.f32 %v718_v46, %v309_v13 }
 0x143   : > { %v350_v51 = vmul.f32 %v653_v44, %v340_v47 }
 0x144   : > { %v720_v52 = vpop.eup %719  ;;  %v351_v56 = vmul.f32 %v653_v44, %v341_v50 }
 0x145   : > { %v360_v54 = vadd.f32 %v654_v49, %v350_v51  ;;  %v342_v55 = vmul.f32 %v720_v52, %v310_v21 }
 0x146   : > { %v361_v59 = vadd.f32 %v654_v49, %v351_v56  ;;  %v666_v56 = vld [vmem:[%s871_s6] ss:$0 sm:$0xff] }
 0x147   : > { %v363_v57 = vpack.c.bf16 %v360_v54, %v359_v53  ;;  %v352_v58 = vmul.f32 %v653_v44, %v342_v55 }
 0x149   : > { %683 = vmatprep.mubr.msk.bf16.mxu0 %vm289_vm0, %v363_v57  ;;  %v362_v60 = vadd.f32 %v654_v49, %v352_v58 }
 0x14b   : > { %v364_v61 = vpack.c.bf16 %v362_v60, %v361_v59 }
 0x14d   : > { %684 = vmatmul.mubr.msk.bf16.vlgmr.msra.gmra.mxu0 %vm289_vm0, %v364_v61 }
 0x20d   : > { %v685_v7 = vpop.f32.mrf.mxu0 }
 0x20e   : > { %v437_v8 = vadd.f32 %v685_v7, %v655_v6 }
 0x20f   : > { %v428_v9 = vpop.f32.mrf.mxu0 }
 0x210   : > { %v445_v10 = vmul.f32 %v437_v8, %v437_v8  ;;  %v429_v11 = vadd.f32 %v655_v6, %v428_v9 }
 0x211   : > { %v686_v12 = vpop.f32.mrf.mxu0 }
 0x212   : > { %v449_v13 = vmul.f32 %v445_v10, %v437_v8  ;;  %v443_v14 = vmul.f32 %v429_v11, %v429_v11  ;;  %v440_v15 = vadd.f32 %v686_v12, %v655_v6 }
 0x213   : > { %v431_v16 = vpop.f32.mrf.mxu0 }
 0x214   : > { %v453_v17 = vmul.f32 0.044715, %v449_v13  ;;  %v447_v18 = vmul.f32 %v443_v14, %v429_v11  ;;  %v446_v19 = vmul.f32 %v440_v15, %v440_v15  ;;  %v432_v20 = vadd.f32 %v655_v6, %v431_v16 }
 0x216   : > { %v457_v21 = vadd.f32 %v453_v17, %v437_v8  ;;  %v451_v22 = vmul.f32 0.044715, %v447_v18  ;;  %v450_v23 = vmul.f32 %v446_v19, %v440_v15  ;;  %v444_v24 = vmul.f32 %v432_v20, %v432_v20 }
 0x218   : > { %v461_v25 = vmul.f32 0.7978846, %v457_v21  ;;  %v455_v26 = vadd.f32 %v451_v22, %v429_v11  ;;  %v454_v27 = vmul.f32 0.044715, %v450_v23  ;;  %v448_v28 = vmul.f32 %v444_v24, %v432_v20 }
 0x21a   : > { %v459_v29 = vmul.f32 0.7978846, %v455_v26  ;;  %v458_v30 = vadd.f32 %v454_v27, %v440_v15  ;;  %v452_v31 = vmul.f32 0.044715, %v448_v28  ;;  %721 = vtanh.f32 %v461_v25 }
 0x21c   : > { %v462_v32 = vmul.f32 0.7978846, %v458_v30  ;;  %v456_v33 = vadd.f32 %v452_v31, %v432_v20  ;;  %723 = vtanh.f32 %v459_v29 }
 0x21e   : > { %725 = vtanh.f32 %v462_v32  ;;  %v460_v34 = vmul.f32 0.7978846, %v456_v33 }
 0x220   : > { %727 = vtanh.f32 %v460_v34 }
 0x227   : > { %v722_v35 = vpop.eup %721 }
 0x228   : > { %v469_v39 = vadd.f32 1.0, %v722_v35 }
 0x229   : > { %v724_v36 = vpop.eup %723 }
 0x22a   : > { %v467_v37 = vadd.f32 1.0, %v724_v36  ;;  %v473_v45 = vmul.f32 0.5, %v469_v39 }
 0x22b   : > { %v726_v38 = vpop.eup %725 }
 0x22c   : > { %v470_v40 = vadd.f32 1.0, %v726_v38  ;;  %v471_v44 = vmul.f32 0.5, %v467_v37  ;;  %v477_v50 = vmul.f32 %v473_v45, %v437_v8 }
 0x22d   : > { %v728_v41 = vpop.eup %727 }
 0x22e   : > { %v474_v42 = vmul.f32 0.5, %v470_v40  ;;  %v468_v43 = vadd.f32 1.0, %v728_v41  ;;  %v475_v48 = vmul.f32 %v471_v44, %v429_v11 }
 0x230   : > { %v472_v46 = vmul.f32 0.5, %v468_v43  ;;  %v478_v47 = vmul.f32 %v474_v42, %v440_v15 }
 0x232   : > { %v476_v49 = vmul.f32 %v472_v46, %v432_v20  ;;  %v480_v52 = vpack.c.bf16 %v478_v47, %v477_v50 }
 0x234   : > { %v479_v51 = vpack.c.bf16 %v476_v49, %v475_v48 }
 0x236   : > { %695 = vmatprep.mubr.msk.bf16.mxu1 %vm513_vm1, %v479_v51 }
 0x237   : > { %696 = vmatmul.mubr.msk.bf16.vlgmr.msra.gmra.mxu1 %vm513_vm1, %v480_v52 }
 0x2f7   : > { %v697_v53 = vpop.f32.mrf.mxu1 }
 0x2f8   : > { %v571_v59 = vadd.f32 %v697_v53, %v795_v1 }
 0x2f9   : > { %v554_v54 = vpop.f32.mrf.mxu1 }
 0x2fa   : > { %v569_v55 = vadd.f32 %v554_v54, %v793_v0  ;;  %v582_v63 = vadd.f32 %v666_v56, %v571_v59 }
 0x2fb   : > { %v698_v57 = vpop.f32.mrf.mxu1 }
 0x2fc   : > { %v580_v58 = vadd.f32 %v666_v56, %v569_v55  ;;  %v572_v61 = vadd.f32 %v698_v57, %v803_v5  ;;  %586 = vst.msk [vmem:[%s280_s8 + $0x10] sm:$0xff] %vm289_vm0, %v582_v63 }
 0x2fd   : > { %v557_v60 = vpop.f32.mrf.mxu1 }
 0x2fe   : > { %584 = vst.msk [vmem:[%s280_s8] sm:$0xff] %vm289_vm0, %v580_v58  ;;  %v570_v0 = vadd.f32 %v557_v60, %v797_v2  ;;  %v583_v3 = vadd.f32 %v666_v56, %v572_v61 }
 0x300   : > { %v581_v62 = vadd.f32 %v666_v56, %v570_v0  ;;  %587 = vst.msk [vmem:[%s280_s8 + $0x18] sm:$0xff] %vm289_vm0, %v583_v3 }
 0x302   : > { %585 = vst.msk [vmem:[%s280_s8 + $0x8] sm:$0xff] %vm289_vm0, %v581_v62 }
 0x303 PF: > { %s17_s24 = sadd.s32 1, %s735_s24  }
 0x304   : > { %p14_p4 = scmp.ge.s32.totalorder %s17_s24, 4  }
 0x306   :  { %16 = sbr.rel (!%p14_p4) target bundleno = 1 (0x1), region = 78 }

// kernel: vitpose_lora_forward.6
= control target key start
LH: loop header
LB: loop body
LE: loop exit
PB: predicated region body
PF: predicated region fallthrough
CT: control target
= control target key end

     0   :  { %s1086_s24 = smov 0   ;;  %s1216_s0 = inlined_call_operand.vmem [shape: f32[4,16,32], index: 0, kind: input, shape index: {}]   ;;  %s1217_s1 = inlined_call_operand.vmem [shape: f32[1,32], index: 1, kind: input, shape index: {}]   ;;  %s1218_s2 = inlined_call_operand.vmem [shape: f32[1,32], index: 2, kind: input, shape index: {}]   ;;  %s1219_s3 = inlined_call_operand.vmem [shape: bf16[32,96], index: 3, kind: input, shape index: {}]   ;;  %s1220_s4 = inlined_call_operand.vmem [shape: f32[1,96], index: 4, kind: input, shape index: {}]   ;;  %s1221_s5 = inlined_call_operand.vmem [shape: bf16[32,32], index: 5, kind: input, shape index: {}]   ;;  %s1222_s6 = inlined_call_operand.vmem [shape: f32[1,32], index: 6, kind: input, shape index: {}]   ;;  %s1223_s7 = inlined_call_operand.vmem [shape: f32[4,16,32], index: 7, kind: output, shape index: {}]  }
   0x1 LB: > { %s883_s25 = sadd.s32 4294967295, %s1036_s24   ;;  %p887_p0 = scmp.ge.s32.totalorder %s1036_s24, 1  ;;  %s1036_s24 = sphi %s1086_s24, %s17_s24  }
   0x2   : > { %p237_p1 = scmp.lt.s32.totalorder %s1036_s24, 5 }
   0x4   : > { %p238_p2 = pnand %p887_p0, %p237_p1 }
   0x5   : > { %p269_p3 = scmp.lt.s32.totalorder (!%p238_p2), %s883_s25, 3  ;;  %s1040_s17 = smov (!%p238_p2), 80  }
   0x6   : > { %241 = sbr.rel (%p238_p2) target bundleno = 1696 (0x6a0), region = 48  ;;  %s1041_s18 = smov (!%p238_p2), 96  }
   0x7   : > { %s1042_s19 = smov (!%p238_p2), 112   ;;  %s1043_s20 = smov (!%p238_p2), 48  }
   0x8   : > { %s1044_s21 = smov (!%p238_p2), 64  }
   0xb   : > { %s1225_s25 = smov (!%p269_p3, %s883_s25), 3  ;;  %vm284_vm0 = vcmask 261120   ;;  %v999_v14 = vld [vmem:[%s1219_s3 + $0x8] sm:$0xff]   ;;  %v1038_v15 = vmov 0.0   ;;  %vm1039_vm1 = vmmov 0   ;;  %v1000_v16 = vld [vmem:[%s1219_s3] sm:$0xff]  }
   0xc   : > { %s921_s26 = sshll.u32 %s1225_s25, 4  ;;  %943 = vmatprep.subr.bf16.mxu0 %v1038_v15  ;;  %947 = vmatprep.mubr.msk.bf16.mxu0 %vm1039_vm1, %v1038_v15  ;;  %v892_v25 = vld [vmem:[%s1217_s1] ss:$0 sm:$0xff]  ;;  %vm404_vm2 = vcmask 125952   ;;  %vm468_vm3 = vcmask 130048   ;;  %vm745_vm4 = vcmask 257152  }
   0xd   : > { %s273_s29 = scalar_lea.vmem %s1216_s0, %s921_s26  ;;  %944 = vmatpush3.bf16.msra.mxu0 %v999_v14  ;;  %951 = vmatprep.subr.bf16.mxu1 %v1038_v15  ;;  %v893_v29 = vld [vmem:[%s1218_s2] ss:$0 sm:$0xff]  ;;  %s278_s11 = scalar_lea.vmem %s1223_s7, %s921_s26 }
   0xe   : > { %v1102_v0 = vld [vmem:[%s273_s29] sm:$0xff]  ;;  %v1104_v1 = vld [vmem:[%s273_s29 + $0x8] sm:$0xff]  ;;  %945 = vmatprep.subr.bf16.mxu0 %v1038_v15  ;;  %953 = vmatprep.mubr.msk.bf16.mxu1 %vm1039_vm1, %v1038_v15  ;;  %s1045_s29 = smov 16  }
   0xf   : > { %v285_v2 = vsel %vm284_vm0, %v1102_v0, 0.0  ;;  %v288_v3 = vsel %vm284_vm0, %v1104_v1, 0.0  ;;  %v894_v34 = vld [vmem:[%s1220_s4] ss:$0 sm:$0xff] }
  0x10   : > { %286 = vadd.xlane.f32.xlu0 %v285_v2 }
  0x11   : > { %946 = vmatpush3.bf16.msra.mxu0 %v1000_v16 }
  0x12   : > { %957 = vmatprep.subr.bf16.mxu0 %v1038_v15 }
  0x14   : > { %289 = vadd.xlane.f32.xlu0 %v288_v3 }
  0x99   : > { %v287_v4 = vpop.xlane.xlu0 %286 }
  0x9a   : > { %v292_v5 = vmul.f32 0.03125, %v287_v4 }
  0x9c   : > { %v294_v6 = vsub.f32 %v1102_v0, %v292_v5 }
  0x9d   : > { %v290_v7 = vpop.xlane.xlu0 %289 }
  0x9e   : > { %v293_v8 = vmul.f32 0.03125, %v290_v7  ;;  %v296_v9 = vmul.f32 %v294_v6, %v294_v6 }
  0xa0   : > { %v295_v10 = vsub.f32 %v1104_v1, %v293_v8  ;;  %v298_v11 = vsel %vm284_vm0, %v296_v9, 0.0 }
  0xa1   : > { %299 = vadd.xlane.f32.xlu1 %v298_v11 }
  0xa2   : > { %v297_v12 = vmul.f32 %v295_v10, %v295_v10 }
  0xa4   : > { %v301_v13 = vsel %vm284_vm0, %v297_v12, 0.0 }
  0xa5   : > { %302 = vadd.xlane.f32.xlu1 %v301_v13 }
 0x12a   : > { %v300_v17 = vpop.xlane.xlu1 %299 }
 0x12b   : > { %v304_v18 = vmul.f32 0.03125, %v300_v17 }
 0x12d   : > { %v306_v19 = vadd.f32 1e-12, %v304_v18 }
 0x12e   : > { %v303_v20 = vpop.xlane.xlu1 %302 }
 0x12f   : > { %1010 = vrsqrt.f32 %v306_v19  ;;  %v305_v21 = vmul.f32 0.03125, %v303_v20 }
 0x131   : > { %v307_v22 = vadd.f32 1e-12, %v305_v21 }
 0x133   : > { %1012 = vrsqrt.f32 %v307_v22 }
 0x13c   : > { %v1011_v23 = vpop.eup %1010 }
 0x13d   : > { %v310_v24 = vmul.f32 %v1011_v23, %v294_v6 }
 0x13f   : > { %v318_v28 = vmul.f32 %v892_v25, %v310_v24 }
 0x140   : > { %v1013_v26 = vpop.eup %1012 }
 0x141   : > { %v311_v27 = vmul.f32 %v1013_v26, %v295_v10  ;;  %v326_v31 = vadd.f32 %v893_v29, %v318_v28 }
 0x143   : > { %v319_v30 = vmul.f32 %v892_v25, %v311_v27 }
 0x145   : > { %v327_v32 = vadd.f32 %v893_v29, %v319_v30 }
 0x147   : > { %v328_v33 = vpack.c.bf16 %v327_v32, %v326_v31 }
 0x149   : > { %948 = vmatmul.mubr.msk.bf16.vlgmr.msra.gmra.mxu0 %vm284_vm0, %v328_v33 }
 0x14a   : > { %959 = vmatprep.mubr.msk.bf16.mxu0 %vm1039_vm1, %v1038_v15 }
 0x209   : > { %v389_v35 = vpop.f32.mrf.mxu0 }
 0x20a   : > { %v390_v36 = vadd.f32 %v894_v34, %v389_v35 }
 0x20b   : > { %v949_v37 = vpop.f32.mrf.mxu0 }
 0x20c   : > { %v1140_v38 = vpack.c.bf16 %v390_v36, %v390_v36 }
 0x20d   : > { %v392_v39 = vpop.f32.mrf.mxu0 }
 0x20e   : > { %405 = vst.msk [vmem:[#allocation2] sm:$0xf] %vm404_vm2, %v1140_v38  ;;  %v393_v40 = vadd.f32 %v894_v34, %v392_v39  ;;  %432 = vrot.lane.b32.xlu0 %v1140_v38, %s1040_s17 }
 0x20f   : > { %v950_v41 = vpop.f32.mrf.mxu0 }
 0x210   : > { %v1145_v42 = vpack.c.bf16 %v393_v40, %v393_v40 }
 0x212   : > { %406 = vst.msk [vmem:[#allocation2 + $0x4] sm:$0xf] %vm404_vm2, %v1145_v42  ;;  %407 = vrot.lane.b32.xlu0 %v1140_v38, %s1041_s18  ;;  %434 = vrot.lane.b32.xlu1 %v1145_v42, %s1040_s17 }
 0x216   : > { %423 = vrot.lane.b32.xlu1 %v1140_v38, %s1042_s19 }
 0x219   : > { %v1004_v54 = vld [vmem:[#allocation2] sm:$0xff]  }
 0x21a   : > { %425 = vrot.lane.b32.xlu1 %v1145_v42, %s1042_s19 }
 0x21e   : > { %409 = vrot.lane.b32.xlu1 %v1145_v42, %s1041_s18 }
 0x280   : > { %v433_v43 = vpop.permute.xlu0 %432 }
 0x281   : > { %439 = vst.msk [vmem:[#allocation3 + $0x8] sm:$0xf] %vm404_vm2, %v433_v43 }
 0x284   : > { %v408_v44 = vpop.permute.xlu0 %407  ;;  %v435_v45 = vpop.permute.xlu1 %434 }
 0x285   : > { %413 = vst.msk [vmem:[#allocation3] sm:$0xf] %vm404_vm2, %v408_v44  ;;  %440 = vst.msk [vmem:[#allocation3 + $0xc] sm:$0xf] %vm404_vm2, %v435_v45 }
 0x288   : > { %v424_v46 = vpop.permute.xlu1 %423 }
 0x289   : > { %430 = vst.msk [vmem:[#allocation2 + $0x8] sm:$0xf] %vm404_vm2, %v424_v46  ;;  %v1007_v46 = vld [vmem:[%s1221_s5 + $0x8] sm:$0xff]  }
 0x28c   : > { %v426_v47 = vpop.permute.xlu1 %425  ;;  %v1001_v48 = vld [vmem:[#allocation3 + $0x8] sm:$0xff]  }
 0x28d   : > { %431 = vst.msk [vmem:[#allocation2 + $0xc] sm:$0xf] %vm404_vm2, %v426_v47  ;;  %v530_v49 = vsel %vm468_vm3, %v1001_v48, 0  ;;  %v1008_v47 = vld [vmem:[%s1221_s5] sm:$0xff]  }
 0x28e   : > { %958 = vmatpush3.bf16.xpose.msra.mxu0 %v530_v49 }
 0x28f   : > { %969 = vmatprep.subr.bf16.mxu0 %v1038_v15 }
 0x290   : > { %v410_v50 = vpop.permute.xlu1 %409 }
 0x291   : > { %414 = vst.msk [vmem:[#allocation3 + $0x4] sm:$0xf] %vm404_vm2, %v410_v50 }
 0x294   : > { %v1002_v51 = vld [vmem:[#allocation2 + $0x8] sm:$0xff]  }
 0x295   : > { %960 = vmatmul.mubr.msk.bf16.vlgmr.msra.gmra.mxu0 %vm468_vm3, %v1002_v51 }
 0x296   : > { %971 = vmatprep.mubr.msk.bf16.mxu0 %vm1039_vm1, %v1038_v15 }
 0x298   : > { %v1003_v52 = vld [vmem:[#allocation3] sm:$0xff]  }
 0x299   : > { %v473_v53 = vsel %vm468_vm3, %v1003_v52, 0 }
 0x29a   : > { %952 = vmatpush3.bf16.xpose.msra.mxu1 %v473_v53 }
 0x29b   : > { %963 = vmatprep.subr.bf16.mxu1 %v1038_v15 }
 0x2a1   : > { %954 = vmatmul.mubr.msk.bf16.vlgmr.msra.gmra.mxu1 %vm468_vm3, %v1004_v54 }
 0x2a2   : > { %965 = vmatprep.mubr.msk.bf16.mxu1 %vm1039_vm1, %v1038_v15 }
 0x355   : > { %v566_v55 = vpop.f32.mrf.mxu0 }
 0x356   : > { %v579_v56 = vsel %vm468_vm3, %v566_v55, -inf }
 0x357   : > { %580 = vmax.xlane.f32.xlu0 %v579_v56  ;;  %v961_v57 = vpop.f32.mrf.mxu0 }
 0x359   : > { %v569_v58 = vpop.f32.mrf.mxu0 }
 0x35a   : > { %v582_v59 = vsel %vm468_vm3, %v569_v58, -inf }
 0x35b   : > { %583 = vmax.xlane.f32.xlu1 %v582_v59  ;;  %v962_v60 = vpop.f32.mrf.mxu0 }
 0x361   : > { %v509_v61 = vpop.f32.mrf.mxu1 }
 0x362   : > { %v573_v62 = vsel %vm468_vm3, %v509_v61, -inf }
 0x363   : > { %v955_v63 = vpop.f32.mrf.mxu1  ;;  %574 = vmax.xlane.f32.xlu0 %v573_v62 }
 0x364   : > { %v918_v63 = vld [vmem:[%s1222_s6] ss:$0 sm:$0xff] }
 0x365   : > { %v512_v2 = vpop.f32.mrf.mxu1 }
 0x366   : > { %v576_v3 = vsel %vm468_vm3, %v512_v2, -inf }
 0x367   : > { %v956_v4 = vpop.f32.mrf.mxu1  ;;  %577 = vmax.xlane.f32.xlu0 %v576_v3 }
 0x3e0   : > { %v581_v5 = vpop.xlane.xlu0 %580 }
 0x3e1   : > { %v587_v6 = vsub.f32 %v566_v55, %v581_v5 }
 0x3e3   : > { %v593_v7 = vmul.f32 1.442695, %v587_v6 }
 0x3e4   : > { %v584_v8 = vpop.xlane.xlu1 %583 }
 0x3e5   : > { %1014 = vpow2.f32 %v593_v7  ;;  %v588_v9 = vsub.f32 %v569_v58, %v584_v8 }
 0x3e7   : > { %v595_v10 = vmul.f32 1.442695, %v588_v9 }
 0x3e9   : > { %1016 = vpow2.f32 %v595_v10 }
 0x3ec   : > { %v575_v16 = vpop.xlane.xlu0 %574 }
 0x3ed   : > { %v585_v19 = vsub.f32 %v509_v61, %v575_v16 }
 0x3ef   : > { %v589_v21 = vmul.f32 1.442695, %v585_v19 }
 0x3f0   : > { %v578_v17 = vpop.xlane.xlu0 %577 }
 0x3f1   : > { %v586_v18 = vsub.f32 %v512_v2, %v578_v17 }
 0x3f2   : > { %v1015_v11 = vpop.eup %1014 }
 0x3f3   : > { %v603_v12 = vsel %vm468_vm3, %v1015_v11, 0.0  ;;  %v591_v20 = vmul.f32 1.442695, %v586_v18 }
 0x3f4   : > { %604 = vadd.xlane.f32.xlu0 %v603_v12 }
 0x3f5   : > { %1018 = vpow2.f32 %v591_v20 }
 0x3f6   : > { %v1017_v13 = vpop.eup %1016  ;;  %1020 = vpow2.f32 %v589_v21 }
 0x3f7   : > { %v606_v14 = vsel %vm468_vm3, %v1017_v13, 0.0 }
 0x3f8   : > { %607 = vadd.xlane.f32.xlu1 %v606_v14 }
 0x402   : > { %v1019_v22 = vpop.eup %1018 }
 0x403   : > { %v600_v23 = vsel %vm468_vm3, %v1019_v22, 0.0  ;;  %v1021_v24 = vpop.eup %1020 }
 0x404   : > { %v597_v25 = vsel %vm468_vm3, %v1021_v24, 0.0 }
 0x409   : > { %443 = vrot.lane.b32.xlu1 %v1145_v42, %s1043_s20 }
 0x40a   : > { %441 = vrot.lane.b32.xlu0 %v1140_v38, %s1043_s20 }
 0x429   : > { %601 = vadd.xlane.f32.xlu0 %v600_v23 }
 0x42d   : > { %598 = vadd.xlane.f32.xlu1 %v597_v25 }
 0x43e   : > { %417 = vrot.lane.b32.xlu1 %v1145_v42, %s1044_s21 }
 0x43f   : > { %415 = vrot.lane.b32.xlu0 %v1140_v38, %s1044_s21 }
 0x47d   : > { %v605_v26 = vpop.xlane.xlu0 %604 }
 0x47e   : > { %1022 = vrcp.f32 %v605_v26 }
 0x481   : > { %v442_v27 = vpop.permute.xlu0 %441  ;;  %v608_v28 = vpop.xlane.xlu1 %607 }
 0x482   : > { %448 = vst.msk [vmem:[#allocation4 + $0x8] sm:$0xf] %vm404_vm2, %v442_v27  ;;  %1024 = vrcp.f32 %v608_v28 }
 0x485   : > { %v444_v29 = vpop.permute.xlu1 %443 }
 0x486   : > { %449 = vst.msk [vmem:[#allocation4 + $0xc] sm:$0xf] %vm404_vm2, %v444_v29 }
 0x48b   : > { %v1023_v30 = vpop.eup %1022 }
 0x48c   : > { %v615_v33 = vmul.f32 %v1023_v30, %v1015_v11 }
 0x48d   : > { %v1005_v31 = vld [vmem:[#allocation4 + $0x8] sm:$0xff]  }
 0x48e   : > { %970 = vmatpush3.bf16.msra.mxu0 %v1005_v31 }
 0x48f   : > { %v1025_v32 = vpop.eup %1024 }
 0x490   : > { %v616_v34 = vmul.f32 %v1025_v32, %v1017_v13 }
 0x492   : > { %v618_v35 = vpack.c.bf16 %v616_v34, %v615_v33 }
 0x494   : > { %972 = vmatmul.mubr.msk.bf16.vlgmr.msra.gmra.mxu0 %vm468_vm3, %v618_v35 }
 0x4b2   : > { %v602_v36 = vpop.xlane.xlu0 %601 }
 0x4b3   : > { %1026 = vrcp.f32 %v602_v36 }
 0x4b6   : > { %v416_v37 = vpop.permute.xlu0 %415  ;;  %v599_v38 = vpop.xlane.xlu1 %598 }
 0x4b7   : > { %421 = vst.msk [vmem:[#allocation4] sm:$0xf] %vm404_vm2, %v416_v37  ;;  %1028 = vrcp.f32 %v599_v38 }
 0x4ba   : > { %v418_v39 = vpop.permute.xlu1 %417 }
 0x4bb   : > { %422 = vst.msk [vmem:[#allocation4 + $0x4] sm:$0xf] %vm404_vm2, %v418_v39 }
 0x4c0   : > { %v1027_v40 = vpop.eup %1026 }
 0x4c1   : > { %v614_v44 = vmul.f32 %v1027_v40, %v1019_v22 }
 0x4c2   : > { %v1006_v41 = vld [vmem:[#allocation4] sm:$0xff]  }
 0x4c3   : > { %964 = vmatpush3.bf16.msra.mxu1 %v1006_v41 }
 0x4c4   : > { %v1029_v42 = vpop.eup %1028  ;;  %975 = vmatprep.subr.bf16.mxu1 %v1038_v15 }
 0x4c5   : > { %v613_v43 = vmul.f32 %v1029_v42, %v1021_v24 }
 0x4c7   : > { %v617_v45 = vpack.c.bf16 %v614_v44, %v613_v43 }
 0x4c9   : > { %966 = vmatmul.mubr.msk.bf16.vlgmr.msra.gmra.mxu1 %vm468_vm3, %v617_v45 }
 0x4ca   : > { %979 = vmatprep.mubr.msk.bf16.mxu1 %vm1039_vm1, %v1038_v15  ;;  %976 = vmatpush3.bf16.msra.mxu1 %v1007_v46 }
 0x4cb   : > { %977 = vmatprep.subr.bf16.mxu1 %v1038_v15 }
 0x4ce   : > { %978 = vmatpush3.bf16.msra.mxu1 %v1008_v47 }
 0x554   : > { %v716_v48 = vpop.f32.mrf.mxu0 }
 0x555   : > { %v927_v49 = vpack.c.bf16 %v716_v48, %v716_v48 }
 0x556   : > { %v973_v50 = vpop.f32.mrf.mxu0 }
 0x557   : > { %739 = vrot.lane.b32.xlu1 %v927_v49, %s1045_s29 }
 0x558   : > { %v719_v51 = vpop.f32.mrf.mxu0 }
 0x559   : > { %v928_v52 = vpack.c.bf16 %v719_v51, %v719_v51 }
 0x55a   : > { %v974_v53 = vpop.f32.mrf.mxu0 }
 0x55b   : > { %741 = vrot.lane.b32.xlu1 %v928_v52, %s1045_s29 }
 0x589   : > { %v666_v54 = vpop.f32.mrf.mxu1 }
 0x58a   : > { %v925_v55 = vpack.c.bf16 %v666_v54, %v666_v54 }
 0x58b   : > { %v967_v56 = vpop.f32.mrf.mxu1 }
 0x58c   : > { %731 = vst.msk [vmem:[#allocation5] sm:$0xf] %vm404_vm2, %v925_v55 }
 0x58d   : > { %v669_v57 = vpop.f32.mrf.mxu1 }
 0x58e   : > { %v926_v58 = vpack.c.bf16 %v669_v57, %v669_v57 }
 0x58f   : > { %v968_v59 = vpop.f32.mrf.mxu1 }
 0x590   : > { %732 = vst.msk [vmem:[#allocation5 + $0x4] sm:$0xf] %vm404_vm2, %v926_v58 }
 0x5c9   : > { %v740_v15 = vpop.permute.xlu1 %739 }
 0x5ca   : > { %746 = vst.msk [vmem:[#allocation5] sm:$0xf] %vm745_vm4, %v740_v15 }
 0x5cd   : > { %v742_v60 = vpop.permute.xlu1 %741 }
 0x5ce   : > { %747 = vst.msk [vmem:[#allocation5 + $0x4] sm:$0xf] %vm745_vm4, %v742_v60 }
 0x5d5   : > { %v1009_v61 = vld [vmem:[#allocation5] sm:$0xff]  }
 0x5d6   : > { %980 = vmatmul.mubr.msk.bf16.vlgmr.msra.gmra.mxu1 %vm284_vm0, %v1009_v61 }
 0x696   : > { %v808_v62 = vpop.f32.mrf.mxu1 }
 0x697   : > { %v815_v2 = vadd.f32 %v808_v62, %v1102_v0 }
 0x698   : > { %v981_v3 = vpop.f32.mrf.mxu1 }
 0x699   : > { %v824_v4 = vadd.f32 %v918_v63, %v815_v2 }
 0x69a   : > { %v811_v5 = vpop.f32.mrf.mxu1 }
 0x69b   : > { %826 = vst.msk [vmem:[%s278_s11] sm:$0xff] %vm284_vm0, %v824_v4  ;;  %v816_v6 = vadd.f32 %v811_v5, %v1104_v1 }
 0x69c   : > { %v982_v7 = vpop.f32.mrf.mxu1 }
 0x69d   : > { %v825_v8 = vadd.f32 %v918_v63, %v816_v6 }
 0x69f   : > { %827 = vst.msk [vmem:[%s278_s11 + $0x8] sm:$0xff] %vm284_vm0, %v825_v8 }
 0x6a0 PF: > { %s17_s24 = sadd.s32 1, %s1036_s24  }
 0x6a1   : > { %p14_p4 = scmp.ge.s32.totalorder %s17_s24, 6  }
 0x6a3   :  { %16 = sbr.rel (!%p14_p4) target bundleno = 1 (0x1), region = 81 }

</bundles_post_ra>
